<compile_context>
chip_gen: v5e
topology: v5e:2x2
jax: 0.10.0
libtpu: 0.0.40
codegen_flags: <defaults>
</compile_context>

<pallas_src>
import functools

import jax
import jax.numpy as jnp
import numpy as np
from jax.experimental import pallas as pl
from jax.experimental.pallas import tpu as pltpu

KSIZES = (3, 4, 5)                  # conv kernel heights (fixed by the module)
KMAX = max(KSIZES)
LANE = 128                          # TPU lane width
C_BRANCH = 128                      # per-branch channels padded 100 -> 128
N_FUSED = len(KSIZES) * C_BRANCH    # 384 fused conv output channels


def _round_up(x, m):
    return (x + m - 1) // m * m


def _ceil_div(a, b):
    return -(-a // b)


def textcnn_kernel(emb_ref, w_ref, b_ref, mask_ref, fcw_ref, fcb_ref, out_ref,
                   *, chunks, e_pad, mask_start):
    """im2col conv(3/4/5) -> masked max-over-time -> bias -> relu -> fc.

    emb_ref : (B_TILE, L_pad, E_pad)   bf16  (zero padded time + embed)
    w_ref   : (KMAX*E_pad, 384)        bf16  fused im2col conv weights
    b_ref   : (1, 384)                 f32   fused conv bias
    mask_ref: (acc_len, 384)           f32   additive {0, -inf} time mask
    fcw_ref : (384, C_pad)             bf16
    fcb_ref : (1, C_pad)               f32
    out_ref : (B_TILE, C_pad)          f32
    """
    b_tile = emb_ref.shape[0]
    w = w_ref[...]                                   # VMEM resident, hoisted

    run_max = jnp.full((b_tile, N_FUSED), -jnp.inf, jnp.float32)

    # Static loop over conv-output time chunks: the f32 partial and the im2col
    # buffer stay O(T_TILE) instead of O(L).
    for t0, tt in chunks:
        # im2col: KMAX shifted windows concatenated along the lane-dense embed
        # axis -> a single MXU matmul with contraction depth KMAX*E_pad.
        lhs = jnp.concatenate(
            [emb_ref[:, t0 + k:t0 + k + tt, :] for k in range(KMAX)], axis=-1)
        lhs = lhs.reshape(b_tile * tt, KMAX * e_pad)
        part = jnp.dot(lhs, w, preferred_element_type=jnp.float32)
        part = part.reshape(b_tile, tt, N_FUSED)
        # Additive {0,-inf} mask only where this chunk reaches past the
        # shortest branch's valid range (static decision, exact rewrite).
        if t0 + tt > mask_start:
            part = part + mask_ref[t0:t0 + tt, :][None]
        run_max = jnp.maximum(run_max, jnp.max(part, axis=1))

    # Bias + ReLU hoisted past the max: max(x + b) == max(x) + b and ReLU is
    # monotone, so this is exact and shrinks the elementwise work T-fold.
    pooled = jnp.maximum(run_max + b_ref[...], 0.0)

    # TODO(synk): nn.Dropout(0.5) is the identity at inference; training-mode
    # dropout (random masking) is not implemented here.
    out_ref[...] = (jnp.dot(pooled.astype(fcw_ref.dtype), fcw_ref[...],
                            preferred_element_type=jnp.float32)
                    + fcb_ref[...])


def _pack_params(w1, b1, w2, b2, w3, b3, fcw, fcb, num_classes, e_pad,
                 compute_dtype):
    """Pack weights into lane/MXU-aligned fused tensors (host-side, once)."""
    c_out = w1.shape[2]                              # 100
    c_pad = _round_up(max(num_classes, 1), LANE)     # logits padded lane-dense

    w_f = np.zeros((KMAX * e_pad, N_FUSED), np.float32)
    b_f = np.zeros((1, N_FUSED), np.float32)
    fcw_f = np.zeros((N_FUSED, c_pad), np.float32)
    fcw_np = np.asarray(fcw)
    for br, (w, b) in enumerate(((w1, b1), (w2, b2), (w3, b3))):
        w = np.asarray(w)
        k, e = w.shape[0], w.shape[1]
        lo = br * C_BRANCH
        for kk in range(k):
            w_f[kk * e_pad:kk * e_pad + e, lo:lo + c_out] = w[kk]
        b_f[:, lo:lo + c_out] = np.asarray(b)
        fcw_f[lo:lo + c_out, :num_classes] = fcw_np[br * c_out:(br + 1) * c_out]
    fcb_f = np.zeros((1, c_pad), np.float32)
    fcb_f[:, :num_classes] = np.asarray(fcb)
    return (jnp.asarray(w_f, compute_dtype), jnp.asarray(b_f),
            jnp.asarray(fcw_f, compute_dtype), jnp.asarray(fcb_f), c_pad)


def _default_vmem_limit():
    """~100 MiB on v5e/v6e (128 MiB physical), comfortably below v7x's 64 MiB."""
    try:
        cap = int(pltpu.get_tpu_info().vmem_capacity_bytes)
        return max(32 << 20, min(cap - (12 << 20), 100 << 20))
    except Exception:
        return 48 << 20


def textcnn_forward(emb, w1, b1, w2, b2, w3, b3, fcw, fcb, *,
                    compute_dtype=jnp.bfloat16, batch_tile=256, time_tile=128,
                    vmem_limit_bytes=None):
    B, L, E = emb.shape
    C = fcw.shape[1]
    assert L >= KMAX, "sequence must be at least as long as the largest conv"

    e_pad = _round_up(E, LANE)                       # lane-dense embeddings
    w_f, b_f, fcw_f, fcb_f, c_pad = _pack_params(
        w1, b1, w2, b2, w3, b3, fcw, fcb, C, e_pad, compute_dtype)

    # Conv-output valid lengths per branch and the shared (8-aligned) extent.
    valid_lens = tuple(L - k + 1 for k in KSIZES)    # (L-2, L-3, L-4)
    acc_len = _round_up(valid_lens[0], 8)
    l_pad = _round_up(acc_len + KMAX - 1, 8)

    # Static additive {0, -inf} time mask; channel group c//128 is branch b.
    mask_np = np.zeros((acc_len, N_FUSED), np.float32)
    for br, vl in enumerate(valid_lens):
        mask_np[vl:, br * C_BRANCH:(br + 1) * C_BRANCH] = -np.inf
    mask = jnp.asarray(mask_np)

    # Time chunks for the in-kernel streaming loop.
    t_tile = min(_round_up(max(8, min(time_tile, acc_len)), 8), acc_len)
    chunks = tuple((t0, min(t_tile, acc_len - t0))
                   for t0 in range(0, acc_len, t_tile))

    if vmem_limit_bytes is None:
        vmem_limit_bytes = _default_vmem_limit()

    # Balanced batch tiling: >=2 grid steps whenever the batch allows it
    # (pipelined emb DMA + megacore) without ~2x padding waste.
    n_steps = max(1, _ceil_div(B, batch_tile))
    if B > 8 and n_steps < 2:
        n_steps = 2
    b_tile = _round_up(_ceil_div(B, n_steps), 8)

    def footprint(bt):                               # rough per-step VMEM bytes
        emb_bytes = 2 * bt * l_pad * e_pad * 2       # double-buffered input
        tmp_bytes = bt * t_tile * (KMAX * e_pad * 2 + N_FUSED * 4)
        wgt_bytes = (KMAX * e_pad * N_FUSED * 2 + acc_len * N_FUSED * 4
                     + N_FUSED * c_pad * 2 + 2 * c_pad * 4)
        out_bytes = 2 * bt * c_pad * 4 + bt * N_FUSED * 4
        return emb_bytes + 2 * tmp_bytes + wgt_bytes + out_bytes

    while b_tile > 8 and footprint(b_tile) > int(0.6 * vmem_limit_bytes):
        b_tile = _round_up(b_tile // 2, 8)
    b_pad = _round_up(B, b_tile)

    emb_p = jnp.zeros((b_pad, l_pad, e_pad), compute_dtype)
    emb_p = emb_p.at[:B, :L, :E].set(emb.astype(compute_dtype))

    kernel = functools.partial(textcnn_kernel, chunks=chunks, e_pad=e_pad,
                               mask_start=min(valid_lens))

    out = pl.pallas_call(
        kernel,
        out_shape=jax.ShapeDtypeStruct((b_pad, c_pad), jnp.float32),
        grid=(b_pad // b_tile,),
        in_specs=[
            # batch-tiled activations (pipelined / double-buffered by Pallas)
            pl.BlockSpec((b_tile, l_pad, e_pad), lambda i: (i, 0, 0)),
            # weights / bias / mask: constant block index -> VMEM-resident
            pl.BlockSpec((KMAX * e_pad, N_FUSED), lambda i: (0, 0)),
            pl.BlockSpec((1, N_FUSED), lambda i: (0, 0)),
            pl.BlockSpec((acc_len, N_FUSED), lambda i: (0, 0)),
            pl.BlockSpec((N_FUSED, c_pad), lambda i: (0, 0)),
            pl.BlockSpec((1, c_pad), lambda i: (0, 0)),
        ],
        out_specs=pl.BlockSpec((b_tile, c_pad), lambda i: (i, 0)),
        compiler_params=pltpu.CompilerParams(
            dimension_semantics=("parallel",),       # shard batch on megacore
            vmem_limit_bytes=vmem_limit_bytes,
        ),
    )(emb_p, w_f, b_f, mask, fcw_f, fcb_f)

    return out[:B, :C]


def reference_forward(emb, w1, b1, w2, b2, w3, b3, fcw, fcb):
    """Pure-JAX reference mirroring the PyTorch forward (eval mode).

    The final FC rounds its operands to bf16 (f32 accumulation) to mirror the
    kernel's compute dtype so the comparison isolates kernel correctness.
    """
    L = emb.shape[1]
    hi = jax.lax.Precision.HIGHEST

    def conv_pool(w, b):
        K = w.shape[0]
        T = L - K + 1
        acc = sum(jnp.einsum('ble,eo->blo', emb[:, k:k + T, :], w[k],
                             precision=hi) for k in range(K))
        acc = jax.nn.relu(acc + b[None])
        return acc.max(axis=1)

    cat = jnp.concatenate(
        [conv_pool(w1, b1), conv_pool(w2, b2), conv_pool(w3, b3)], axis=1)
    cat_bf = cat.astype(jnp.bfloat16).astype(jnp.float32)
    return jnp.dot(cat_bf, fcw, precision=hi) + fcb


if __name__ == "__main__":
    # Small, deterministic setup consistent with the module's __init__.
    vocab_size, embed_dim, num_classes = 50, 32, 4
    batch, seq_len = 2, 16
    pad_idx = 0                                  # stand-in for vocab['<pad>']

    key = jax.random.PRNGKey(0)
    ks = jax.random.split(key, 10)

    # nn.Embedding(vocab_size, embed_dim, padding_idx=pad_idx)
    emb_table = 0.1 * jax.random.normal(ks[0], (vocab_size, embed_dim), jnp.float32)
    emb_table = emb_table.at[pad_idx].set(0.0)

    # Conv weights (K, E, 100)  <->  torch (100, 1, K, E); biases (1, 100)
    w1 = 0.1 * jax.random.normal(ks[1], (3, embed_dim, 100), jnp.float32)
    b1 = 0.1 * jax.random.normal(ks[2], (1, 100), jnp.float32)
    w2 = 0.1 * jax.random.normal(ks[3], (4, embed_dim, 100), jnp.float32)
    b2 = 0.1 * jax.random.normal(ks[4], (1, 100), jnp.float32)
    w3 = 0.1 * jax.random.normal(ks[5], (5, embed_dim, 100), jnp.float32)
    b3 = 0.1 * jax.random.normal(ks[6], (1, 100), jnp.float32)

    # fc: Linear(300, num_classes) stored transposed as (300, C), bias (1, C)
    fcw = 0.1 * jax.random.normal(ks[7], (300, num_classes), jnp.float32)
    fcb = 0.1 * jax.random.normal(ks[8], (1, num_classes), jnp.float32)

    # Token ids and embedding lookup.
    # TODO(synk): the nn.Embedding gather stays in plain JAX as glue.
    text = jax.random.randint(ks[9], (batch, seq_len), 0, vocab_size, jnp.int32)
    embedded = jnp.take(emb_table, text, axis=0)      # (B, L, E)

    out = textcnn_forward(embedded, w1, b1, w2, b2, w3, b3, fcw, fcb)
    out = jax.block_until_ready(out)

    # Reference uses the same bf16-rounded matmul operands as the kernel so the
    # comparison isolates kernel correctness (products are exact in f32; only
    # accumulation order and rare bf16 ties differ -> 1e-3 tolerance).
    def rt(x):
        return x.astype(jnp.bfloat16).astype(jnp.float32)

    ref = reference_forward(rt(embedded), rt(w1), b1, rt(w2), b2, rt(w3), b3,
                            rt(fcw), fcb)
    np.testing.assert_allclose(np.asarray(out), np.asarray(ref),
                               rtol=1e-3, atol=1e-3)

    print("KERNEL_OK")
</pallas_src>

<mosaic_0001>
module attributes {stable_mosaic.version = 11 : i64} {
  func.func @textcnn_kernel(%arg0: i32, %arg1: memref<8x24x128xbf16, #tpu.memory_space<vmem>>, %arg2: memref<640x384xbf16, #tpu.memory_space<vmem>>, %arg3: memref<1x384xf32, #tpu.memory_space<vmem>>, %arg4: memref<16x384xf32, #tpu.memory_space<vmem>>, %arg5: memref<384x128xbf16, #tpu.memory_space<vmem>>, %arg6: memref<1x128xf32, #tpu.memory_space<vmem>>, %arg7: memref<8x128xf32, #tpu.memory_space<vmem>>) attributes {dimension_semantics = [#tpu.dimension_semantics<parallel>], iteration_bounds = array<i64: 1>, scalar_prefetch = 0 : i64, scratch_operands = 0 : i64, tpu.core_type = #tpu.core_type<tc>, window_params = [{transform_indices = @transform_0, window_bounds = array<i64: 8, 24, 128>}, {pipeline_mode = #tpu.pipeline_mode<synchronous>, transform_indices = @transform_1, window_bounds = array<i64: 640, 384>}, {pipeline_mode = #tpu.pipeline_mode<synchronous>, transform_indices = @transform_2, window_bounds = array<i64: 1, 384>}, {pipeline_mode = #tpu.pipeline_mode<synchronous>, transform_indices = @transform_3, window_bounds = array<i64: 16, 384>}, {pipeline_mode = #tpu.pipeline_mode<synchronous>, transform_indices = @transform_4, window_bounds = array<i64: 384, 128>}, {pipeline_mode = #tpu.pipeline_mode<synchronous>, transform_indices = @transform_5, window_bounds = array<i64: 1, 128>}, {transform_indices = @transform_6, window_bounds = array<i64: 8, 128>}]} {
    %c0 = arith.constant 0 : index
    %c0_0 = arith.constant 0 : index
    %0 = vector.load %arg2[%c0, %c0_0] : memref<640x384xbf16, #tpu.memory_space<vmem>>, vector<640x384xbf16>
    %cst = arith.constant 0xFF800000 : f32
    %1 = vector.broadcast %cst : f32 to vector<8x384xf32>
    %c0_1 = arith.constant 0 : index
    %c0_2 = arith.constant 0 : index
    %c0_3 = arith.constant 0 : index
    %2 = vector.load %arg1[%c0_1, %c0_2, %c0_3] : memref<8x24x128xbf16, #tpu.memory_space<vmem>>, vector<8x16x128xbf16>
    %c0_4 = arith.constant 0 : index
    %c1 = arith.constant 1 : index
    %c0_5 = arith.constant 0 : index
    %3 = vector.load %arg1[%c0_4, %c1, %c0_5] : memref<8x24x128xbf16, #tpu.memory_space<vmem>>, vector<8x16x128xbf16>
    %c0_6 = arith.constant 0 : index
    %c2 = arith.constant 2 : index
    %c0_7 = arith.constant 0 : index
    %4 = vector.load %arg1[%c0_6, %c2, %c0_7] : memref<8x24x128xbf16, #tpu.memory_space<vmem>>, vector<8x16x128xbf16>
    %c0_8 = arith.constant 0 : index
    %c3 = arith.constant 3 : index
    %c0_9 = arith.constant 0 : index
    %5 = vector.load %arg1[%c0_8, %c3, %c0_9] : memref<8x24x128xbf16, #tpu.memory_space<vmem>>, vector<8x16x128xbf16>
    %c0_10 = arith.constant 0 : index
    %c4 = arith.constant 4 : index
    %c0_11 = arith.constant 0 : index
    %6 = vector.load %arg1[%c0_10, %c4, %c0_11] : memref<8x24x128xbf16, #tpu.memory_space<vmem>>, vector<8x16x128xbf16>
    %7 = tpu.concatenate %2, %3, %4, %5, %6 in 2 : vector<8x16x128xbf16>, vector<8x16x128xbf16>, vector<8x16x128xbf16>, vector<8x16x128xbf16>, vector<8x16x128xbf16> -> vector<8x16x640xbf16>
    %8 = vector.shape_cast %7 : vector<8x16x640xbf16> to vector<128x640xbf16>
    %cst_12 = arith.constant dense<0.000000e+00> : vector<128x384xf32>
    %9 = tpu.matmul %8, %0, %cst_12 {dimension_numbers = #tpu.dot_dimension_numbers<[1], [0], [0], [1], [0, 0, 1, 1], [], []>} : vector<128x640xbf16>, vector<640x384xbf16>, vector<128x384xf32> -> vector<128x384xf32>
    %10 = vector.shape_cast %9 : vector<128x384xf32> to vector<8x16x384xf32>
    %c0_13 = arith.constant 0 : index
    %c0_14 = arith.constant 0 : index
    %11 = vector.load %arg4[%c0_13, %c0_14] : memref<16x384xf32, #tpu.memory_space<vmem>>, vector<16x384xf32>
    %12 = vector.shape_cast %11 : vector<16x384xf32> to vector<1x16x384xf32>
    %13 = vector.broadcast %12 : vector<1x16x384xf32> to vector<8x16x384xf32>
    %14 = arith.addf %10, %13 : vector<8x16x384xf32>
    %cst_15 = arith.constant dense<0xFF800000> : vector<8x384xf32>
    %15 = vector.multi_reduction <maximumf>, %14, %cst_15 [1] : vector<8x16x384xf32> to vector<8x384xf32>
    %16 = arith.maximumf %1, %15 : vector<8x384xf32>
    %c0_16 = arith.constant 0 : index
    %c0_17 = arith.constant 0 : index
    %17 = vector.load %arg3[%c0_16, %c0_17] : memref<1x384xf32, #tpu.memory_space<vmem>>, vector<1x384xf32>
    %18 = vector.broadcast %17 : vector<1x384xf32> to vector<8x384xf32>
    %19 = arith.addf %16, %18 : vector<8x384xf32>
    %cst_18 = arith.constant 0.000000e+00 : f32
    %20 = vector.broadcast %cst_18 : f32 to vector<8x384xf32>
    %21 = arith.maximumf %19, %20 : vector<8x384xf32>
    %22 = arith.truncf %21 : vector<8x384xf32> to vector<8x384xbf16>
    %c0_19 = arith.constant 0 : index
    %c0_20 = arith.constant 0 : index
    %23 = vector.load %arg5[%c0_19, %c0_20] : memref<384x128xbf16, #tpu.memory_space<vmem>>, vector<384x128xbf16>
    %cst_21 = arith.constant dense<0.000000e+00> : vector<8x128xf32>
    %24 = tpu.matmul %22, %23, %cst_21 {dimension_numbers = #tpu.dot_dimension_numbers<[1], [0], [0], [1], [0, 0, 1, 1], [], []>} : vector<8x384xbf16>, vector<384x128xbf16>, vector<8x128xf32> -> vector<8x128xf32>
    %c0_22 = arith.constant 0 : index
    %c0_23 = arith.constant 0 : index
    %25 = vector.load %arg6[%c0_22, %c0_23] : memref<1x128xf32, #tpu.memory_space<vmem>>, vector<1x128xf32>
    %26 = vector.broadcast %25 : vector<1x128xf32> to vector<8x128xf32>
    %27 = arith.addf %24, %26 : vector<8x128xf32>
    %c0_24 = arith.constant 0 : index
    %c0_25 = arith.constant 0 : index
    %28 = vector.load %arg7[%c0_24, %c0_25] : memref<8x128xf32, #tpu.memory_space<vmem>>, vector<8x128xf32>
    tpu.vector_store %arg7[%c0_24, %c0_25], %27 {strides = array<i32>} : memref<8x128xf32, #tpu.memory_space<vmem>>, vector<8x128xf32>,
    return
  }
  func.func @transform_0(%arg0: i32) -> (i32, i32, i32) {
    %c0_i32 = arith.constant 0 : i32
    %c0_i32_0 = arith.constant 0 : i32
    %c0_i32_1 = arith.constant 0 : i32
    return %arg0, %c0_i32, %c0_i32_0 : i32, i32, i32
  }
  func.func @transform_1(%arg0: i32) -> (i32, i32) {
    %c0_i32 = arith.constant 0 : i32
    %c0_i32_0 = arith.constant 0 : i32
    %c0_i32_1 = arith.constant 0 : i32
    return %c0_i32, %c0_i32_0 : i32, i32
  }
  func.func @transform_2(%arg0: i32) -> (i32, i32) {
    %c0_i32 = arith.constant 0 : i32
    %c0_i32_0 = arith.constant 0 : i32
    %c0_i32_1 = arith.constant 0 : i32
    return %c0_i32, %c0_i32_0 : i32, i32
  }
  func.func @transform_3(%arg0: i32) -> (i32, i32) {
    %c0_i32 = arith.constant 0 : i32
    %c0_i32_0 = arith.constant 0 : i32
    %c0_i32_1 = arith.constant 0 : i32
    return %c0_i32, %c0_i32_0 : i32, i32
  }
  func.func @transform_4(%arg0: i32) -> (i32, i32) {
    %c0_i32 = arith.constant 0 : i32
    %c0_i32_0 = arith.constant 0 : i32
    %c0_i32_1 = arith.constant 0 : i32
    return %c0_i32, %c0_i32_0 : i32, i32
  }
  func.func @transform_5(%arg0: i32) -> (i32, i32) {
    %c0_i32 = arith.constant 0 : i32
    %c0_i32_0 = arith.constant 0 : i32
    %c0_i32_1 = arith.constant 0 : i32
    return %c0_i32, %c0_i32_0 : i32, i32
  }
  func.func @transform_6(%arg0: i32) -> (i32, i32) {
    %c0_i32 = arith.constant 0 : i32
    %c0_i32_0 = arith.constant 0 : i32
    return %arg0, %c0_i32 : i32, i32
  }
}

</mosaic_0001>

<bundles_post_ra>
// kernel: tpu_custom_call.1
= control target key start
LH: loop header
LB: loop body
LE: loop exit
PB: predicated region body
PF: predicated region fallthrough
CT: control target
= control target key end

     0   :  { %11 = vsyncpa [#allocation3], 0  ;;  %s4545_s0 = inlined_call_operand.hbm [shape: bf16[8,24,128], index: 0, kind: input, shape index: {}]   ;;  %s4546_s1 = inlined_call_operand.hbm [shape: bf16[640,384], index: 1, kind: input, shape index: {}]   ;;  %s4547_s2 = inlined_call_operand.hbm [shape: f32[1,384], index: 2, kind: input, shape index: {}]   ;;  %s4548_s3 = inlined_call_operand.hbm [shape: f32[16,384], index: 3, kind: input, shape index: {}]   ;;  %s4549_s4 = inlined_call_operand.hbm [shape: bf16[384,128], index: 4, kind: input, shape index: {}]   ;;  %s4550_s5 = inlined_call_operand.vmem [shape: f32[1,128], index: 5, kind: input, shape index: {}]   ;;  %s4551_s6 = inlined_call_operand.hbm [shape: f32[8,128], index: 6, kind: output, shape index: {}]  }
   0x1   :  { %12 = vsyncpa [#allocation6], 0 }
   0x2   :  { %13 = vsyncpa [#allocation9], 0  ;;  %s32_s23 = sshll.u32 %s4546_s1, 4  ;;  %s33_s23 = int_to_ptr.hbm [resolvable:$true] %s32_s23 }
   0x3   :  { %14 = vsyncpa [#allocation4], 0  ;;  %s3812_s24 = smov [#allocation5]   ;;  %s56_s28 = sshll.u32 %s4548_s3, 4  ;;  %s57_s28 = int_to_ptr.hbm [resolvable:$true] %s56_s28 }
   0x4   :  { %s34_s25 = sshll.u32 %s3812_s24, 4  ;;  %s3813_s29 = smov 192   ;;  %s35_s25 = int_to_ptr.vmem [resolvable:$true] %s34_s25 }
   0x5   :  { %s3814_s30 = smov 12   ;;  %s3815_s7 = smov [#allocation8]  }
   0x6   :  { %40 = dma.hbm_to_vmem [thread:$0]  %s33_s23, 15360, %s35_s25, [#allocation6], %s3813_s29, %s3813_s29, %s3814_s30  }
   0x7   :  { %s58_s8 = sshll.u32 %s3815_s7, 4  ;;  %s3816_s9 = smov 384   ;;  %s59_s8 = int_to_ptr.vmem [resolvable:$true] %s58_s8 }
   0x8   :  { %s3817_s10 = smov 24   ;;  %s19_s12 = sshll.u32 %s4545_s0, 4  ;;  %s20_s12 = int_to_ptr.hbm [resolvable:$true] %s19_s12 }
   0x9   :  { %64 = dma.hbm_to_vmem [thread:$0]  %s57_s28, 768, %s59_s8, [#allocation9], %s3816_s9, %s3816_s9, %s3817_s10  }
   0xa   :  { %s3818_s13 = smov [#allocation2]   ;;  %s46_s16 = sshll.u32 %s4547_s2, 4  ;;  %s47_s16 = int_to_ptr.hbm [resolvable:$true] %s46_s16 }
   0xb   :  { %s21_s14 = sshll.u32 %s3818_s13, 4  ;;  %s3819_s17 = smov 64   ;;  %s22_s14 = int_to_ptr.vmem [resolvable:$true] %s21_s14 }
   0xc   :  { %s3820_s18 = smov 4   ;;  %s3821_s19 = smov [#allocation7]  }
   0xd   :  { %27 = dma.hbm_to_vmem [thread:$0]  %s20_s12, 1536, %s22_s14, [#allocation3], %s3819_s17, %s3819_s17, %s3820_s18  }
   0xe   :  { %s48_s20 = sshll.u32 %s3821_s19, 4  ;;  %s69_s23 = sshll.u32 %s4549_s4, 4  ;;  %s49_s20 = int_to_ptr.vmem [resolvable:$true] %s48_s20  ;;  %s70_s23 = int_to_ptr.hbm [resolvable:$true] %s69_s23 }
   0xf   :  { %51 = dma.hbm_to_vmem [thread:$0]  %s47_s16, 48, %s49_s20, [#allocation6]  }
  0x10   :  { %s3822_s0 = smov [#allocation10]  }
  0x11   :  { %s71_s24 = sshll.u32 %s3822_s0, 4  ;;  %s72_s24 = int_to_ptr.vmem [resolvable:$true] %s71_s24 }
  0x12   :  { %77 = dma.hbm_to_vmem [thread:$0]  %s70_s23, 3072, %s72_s24, [#allocation9], %s3819_s17, %s3819_s17, %s3820_s18  }
  0x13   :  { %3804 = dma.done.wait [#allocation3], 1536  }
  0x14   :  { %3805 = vsyncadd [#allocation3], 4294965760 }
  0x15   :  { %3806 = dma.done.wait [#allocation6], 15408  }
  0x16   :  { %3807 = vsyncadd [#allocation6], 4294951888 }
  0x17   :  { %3808 = dma.done.wait [#allocation9], 3840  }
  0x18   :  { %3809 = vsyncadd [#allocation9], 4294963456  ;;  %v2977_v0 = vld [vmem:[#allocation5 + $0xa8] sm:$0xf]  ;;  %v3489_v1 = vld [vmem:[#allocation5 + $0xb0] sm:$0xf0] }
  0x19   :  { %v3073_v2 = vld [vmem:[#allocation5 + $0x168] sm:$0xf]  ;;  %v2978_v3 = vor.u32 %v3489_v1, %v2977_v0  ;;  %v3513_v4 = vld [vmem:[#allocation5 + $0x170] sm:$0xf0]  ;;  %v2965_v11 = vld [vmem:[#allocation5 + $0x90] sm:$0xf] }
  0x1a   :  { %v3169_v5 = vld [vmem:[#allocation5 + $0x228] sm:$0xf]  ;;  %v3537_v6 = vld [vmem:[#allocation5 + $0x230] sm:$0xf0]  ;;  %v3074_v7 = vor.u32 %v3513_v4, %v3073_v2  ;;  %v3486_v13 = vld [vmem:[#allocation5 + $0x98] sm:$0xf0] }
  0x1b   :  { %v3170_v8 = vor.u32 %v3537_v6, %v3169_v5  ;;  %v3265_v9 = vld [vmem:[#allocation5 + $0x2e8] sm:$0xf]  ;;  %v3561_v10 = vld [vmem:[#allocation5 + $0x2f0] sm:$0xf0]  ;;  %1464 = vmatpush.bf16.msra.mxu0 %v2978_v3  ;;  %v3061_v14 = vld [vmem:[#allocation5 + $0x150] sm:$0xf]  ;;  %v2966_v16 = vor.u32 %v3486_v13, %v2965_v11 }
  0x1c   :  { %v3266_v12 = vor.u32 %v3561_v10, %v3265_v9  ;;  %v3510_v15 = vld [vmem:[#allocation5 + $0x158] sm:$0xf0]  ;;  %1513 = vmatpush.bf16.msra.mxu1 %v3074_v7  ;;  %v3157_v18 = vld [vmem:[#allocation5 + $0x210] sm:$0xf]  ;;  %v2953_v23 = vld [vmem:[#allocation5 + $0x78] sm:$0xf] }
  0x1d   :  { %1562 = vmatpush.bf16.msra.mxu2 %v3170_v8  ;;  %v3062_v17 = vor.u32 %v3510_v15, %v3061_v14  ;;  %v3534_v19 = vld [vmem:[#allocation5 + $0x218] sm:$0xf0]  ;;  %v3253_v20 = vld [vmem:[#allocation5 + $0x2d0] sm:$0xf]  ;;  %v3483_v24 = vld [vmem:[#allocation5 + $0x80] sm:$0xf0] }
  0x1e   :  { %1611 = vmatpush.bf16.msra.mxu3 %v3266_v12  ;;  %v3158_v21 = vor.u32 %v3534_v19, %v3157_v18  ;;  %v3558_v22 = vld [vmem:[#allocation5 + $0x2d8] sm:$0xf0]  ;;  %v3049_v26 = vld [vmem:[#allocation5 + $0x138] sm:$0xf]  ;;  %v3507_v27 = vld [vmem:[#allocation5 + $0x140] sm:$0xf0]  ;;  %v2954_v29 = vor.u32 %v3483_v24, %v2953_v23 }
  0x1f   :  { %v3254_v25 = vor.u32 %v3558_v22, %v3253_v20  ;;  %v3145_v28 = vld [vmem:[#allocation5 + $0x1f8] sm:$0xf]  ;;  %1465 = vmatpush.bf16.msra.mxu0 %v2966_v16  ;;  %v3531_v30 = vld [vmem:[#allocation5 + $0x200] sm:$0xf0]  ;;  %v3050_v33 = vor.u32 %v3507_v27, %v3049_v26  ;;  %v2941_v35 = vld [vmem:[#allocation5 + $0x60] sm:$0xf] }
  0x20   :  { %v3241_v31 = vld [vmem:[#allocation5 + $0x2b8] sm:$0xf]  ;;  %v3555_v32 = vld [vmem:[#allocation5 + $0x2c0] sm:$0xf0]  ;;  %1514 = vmatpush.bf16.msra.mxu1 %v3062_v17  ;;  %v3146_v34 = vor.u32 %v3531_v30, %v3145_v28  ;;  %v3480_v36 = vld [vmem:[#allocation5 + $0x68] sm:$0xf0] }
  0x21   :  { %1563 = vmatpush.bf16.msra.mxu2 %v3158_v21  ;;  %v3037_v37 = vld [vmem:[#allocation5 + $0x120] sm:$0xf]  ;;  %v3242_v38 = vor.u32 %v3555_v32, %v3241_v31  ;;  %v3504_v39 = vld [vmem:[#allocation5 + $0x128] sm:$0xf0]  ;;  %v2942_v44 = vor.u32 %v3480_v36, %v2941_v35  ;;  %v2929_v45 = vld [vmem:[#allocation5 + $0x48] sm:$0xf] }
  0x22   :  { %1612 = vmatpush.bf16.msra.mxu3 %v3254_v25  ;;  %v3133_v40 = vld [vmem:[#allocation5 + $0x1e0] sm:$0xf]  ;;  %v3528_v41 = vld [vmem:[#allocation5 + $0x1e8] sm:$0xf0]  ;;  %v3038_v46 = vor.u32 %v3504_v39, %v3037_v37  ;;  %v3477_v48 = vld [vmem:[#allocation5 + $0x50] sm:$0xf0] }
  0x23   :  { %v3229_v42 = vld [vmem:[#allocation5 + $0x2a0] sm:$0xf]  ;;  %v3552_v43 = vld [vmem:[#allocation5 + $0x2a8] sm:$0xf0]  ;;  %1466 = vmatpush.bf16.msra.mxu0 %v2954_v29  ;;  %v3134_v47 = vor.u32 %v3528_v41, %v3133_v40  ;;  %v3025_v49 = vld [vmem:[#allocation5 + $0x108] sm:$0xf]  ;;  %v2930_v58 = vor.u32 %v3477_v48, %v2929_v45 }
  0x24   :  { %1515 = vmatpush.bf16.msra.mxu1 %v3050_v33  ;;  %v3501_v50 = vld [vmem:[#allocation5 + $0x110] sm:$0xf0]  ;;  %v3230_v51 = vor.u32 %v3552_v43, %v3229_v42  ;;  %v3121_v52 = vld [vmem:[#allocation5 + $0x1c8] sm:$0xf]  ;;  %v2917_v56 = vld [vmem:[#allocation5 + $0x30] sm:$0xf] }
  0x25   :  { %1564 = vmatpush.bf16.msra.mxu2 %v3146_v34  ;;  %v3525_v53 = vld [vmem:[#allocation5 + $0x1d0] sm:$0xf0]  ;;  %v3217_v54 = vld [vmem:[#allocation5 + $0x288] sm:$0xf]  ;;  %v3474_v57 = vld [vmem:[#allocation5 + $0x38] sm:$0xf0]  ;;  %v3026_v1 = vor.u32 %v3501_v50, %v3025_v49 }
  0x26   :  { %1613 = vmatpush.bf16.msra.mxu3 %v3242_v38  ;;  %v3549_v55 = vld [vmem:[#allocation5 + $0x290] sm:$0xf0]  ;;  %v3013_v59 = vld [vmem:[#allocation5 + $0xf0] sm:$0xf]  ;;  %v3498_v60 = vld [vmem:[#allocation5 + $0xf8] sm:$0xf0]  ;;  %v3122_v2 = vor.u32 %v3525_v53, %v3121_v52  ;;  %v2918_v13 = vor.u32 %v3474_v57, %v2917_v56 }
  0x27   :  { %1467 = vmatpush.bf16.msra.mxu0 %v2942_v44  ;;  %v3109_v61 = vld [vmem:[#allocation5 + $0x1b0] sm:$0xf]  ;;  %v3522_v62 = vld [vmem:[#allocation5 + $0x1b8] sm:$0xf0]  ;;  %v3874_v3 = vld [vmem:[#allocation5 + $0x18] sm:$0xf]  ;;  %v3218_v6 = vor.u32 %v3549_v55, %v3217_v54  ;;  %v3014_v17 = vor.u32 %v3498_v60, %v3013_v59 }
  0x28   :  { %v3205_v63 = vld [vmem:[#allocation5 + $0x270] sm:$0xf]  ;;  %v3546_v0 = vld [vmem:[#allocation5 + $0x278] sm:$0xf0]  ;;  %1516 = vmatpush.bf16.msra.mxu1 %v3038_v46  ;;  %v3876_v4 = vld [vmem:[#allocation5 + $0x20] sm:$0xf0]  ;;  %v3110_v18 = vor.u32 %v3522_v62, %v3109_v61 }
  0x29   :  { %1565 = vmatpush.bf16.msra.mxu2 %v3134_v47  ;;  %v3878_v5 = vld [vmem:[#allocation5 + $0xd8] sm:$0xf]  ;;  %v3880_v7 = vld [vmem:[#allocation5 + $0xe0] sm:$0xf0]  ;;  %v3890_v12 = vld [vmem:[#allocation5] sm:$0xf]  ;;  %v3206_v19 = vor.u32 %v3546_v0, %v3205_v63  ;;  %v2906_v23 = vor.u32 %v3876_v4, %v3874_v3 }
  0x2a   :  { %1614 = vmatpush.bf16.msra.mxu3 %v3230_v51  ;;  %v3882_v8 = vld [vmem:[#allocation5 + $0x198] sm:$0xf]  ;;  %v3884_v9 = vld [vmem:[#allocation5 + $0x1a0] sm:$0xf0]  ;;  %v3892_v14 = vld [vmem:[#allocation5 + $0x8] sm:$0xf0]  ;;  %v3002_v24 = vor.u32 %v3880_v7, %v3878_v5 }
  0x2b   :  { %v3886_v10 = vld [vmem:[#allocation5 + $0x258] sm:$0xf]  ;;  %v3888_v11 = vld [vmem:[#allocation5 + $0x260] sm:$0xf0]  ;;  %1468 = vmatpush.bf16.msra.mxu0 %v2930_v58  ;;  %v3894_v15 = vld [vmem:[#allocation5 + $0xc0] sm:$0xf]  ;;  %v3098_v25 = vor.u32 %v3884_v9, %v3882_v8  ;;  %v2894_v29 = vor.u32 %v3892_v14, %v3890_v12 }
  0x2c   :  { %v3896_v16 = vld [vmem:[#allocation5 + $0xc8] sm:$0xf0]  ;;  %1517 = vmatpush.bf16.msra.mxu1 %v3026_v1  ;;  %v3898_v20 = vld [vmem:[#allocation5 + $0x180] sm:$0xf]  ;;  %vm436_vm0 = vsmask.f32 7424  ;;  %v3194_v28 = vor.u32 %v3888_v11, %v3886_v10 }
  0x2d   :  { %1566 = vmatpush.bf16.msra.mxu2 %v3122_v2  ;;  %v3900_v21 = vld [vmem:[#allocation5 + $0x188] sm:$0xf0]  ;;  %v3902_v22 = vld [vmem:[#allocation5 + $0x240] sm:$0xf]  ;;  %v278_v30 = vld [vmem:[#allocation2 + $0x8] sm:$0x1]  ;;  %v2990_v38 = vor.u32 %v3896_v16, %v3894_v15 }
  0x2e   :  { %1615 = vmatpush.bf16.msra.mxu3 %v3218_v6  ;;  %v3910_v26 = vld [vmem:[#allocation5 + $0x248] sm:$0xf0]  ;;  %v3912_v27 = vld [vmem:[#allocation2] sm:$0xff]   ;;  %v398_v34 = vunpack.c.l.b16 %v278_v30  ;;  %vm565_vm1 = vcmask 1046528   ;;  %v308_v37 = vld [vmem:[#allocation2 + $0x8] sm:$0x3]  ;;  %v3086_v39 = vor.u32 %v3900_v21, %v3898_v20 }
  0x2f   :  { %v440_v31 = vshll.u32 %v3912_v27, 16  ;;  %v4557_v32 = vunpack.c.h.b16 %v3912_v27  ;;  %v300_v33 = vld [vmem:[#allocation2] sm:$0xe]  ;;  %1469 = vmatpush.bf16.msra.mxu0 %v2918_v13  ;;  %v438_v35 = vshrl.u32 %v3912_v27, 16  ;;  %v606_v41 = vunpack.c.l.b16 %v308_v37  ;;  %v3512_v42 = vld [vmem:[#allocation5 + $0x16c] sm:$0xf] }
  0x30   :  { %v549_v36 = vunpack.c.l.b16 %v300_v33  ;;  %1518 = vmatpush.bf16.msra.mxu1 %v3014_v17  ;;  %v3075_v43 = vld [vmem:[#allocation5 + $0x174] sm:$0xf0]  ;;  %v3925_v44 = vld [vmem:[#allocation2 + $0xc] sm:$0xff]   ;;  %v3182_v45 = vor.u32 %v3910_v26, %v3902_v22  ;;  %v421_v46 = vpack.c.b16 %v398_v34, %v398_v34  ;;  %vm622_vm2 = vsmask.f32 6400  ;;  %v3936_v6 = vld [vmem:[#allocation2] sm:$0xff] }
  0x31   :  { %1567 = vmatpush.bf16.msra.mxu2 %v3110_v18  ;;  %v442_v40 = vrot.slane %v440_v31, 1  ;;  %v3361_v48 = vld [vmem:[#allocation5 + $0x3a8] sm:$0xf]  ;;  %v3585_v49 = vld [vmem:[#allocation5 + $0x3b0] sm:$0xf0]  ;;  %v3931_v50 = vpack.c.b16 %v606_v41, %v606_v41  ;;  %v3078_v51 = vor.u32 %v3512_v42, %v3075_v43  ;;  %v4556_v55 = vunpack.c.h.b16 %v3925_v44  ;;  %s3823_s25 = smov [#allocation11]  }
  0x32   :  { %1616 = vmatpush.bf16.msra.mxu3 %v3206_v19  ;;  %v557_v47 = vpack.c.b16 %v4557_v32, %v549_v36  ;;  %v3488_v52 = vld [vmem:[#allocation5 + $0xac] sm:$0xf]  ;;  %v2979_v53 = vld [vmem:[#allocation5 + $0xb4] sm:$0xf0]  ;;  %v281_v54 = vld [vmem:[#allocation2 + $0x14] sm:$0x1]  ;;  %v3362_v4 = vor.u32 %v3585_v49, %v3361_v48 }
  0x33   :  { %1470 = vmatpush.bf16.msra.mxu0 %v2906_v23  ;;  %v445_v56 = vshll.u32 %v421_v46, 16  ;;  %v567_v58 = vrot.slane %v421_v46, 1  ;;  %v301_v60 = vld [vmem:[#allocation2 + $0xc] sm:$0xe]  ;;  %v443_v61 = vor.u32 %v442_v40, %v438_v35  ;;  %v632_v63 = vshrl.u32 %v3931_v50, 16  ;;  %s2845_s26 = sshll.u32 %s3823_s25, 4  ;;  %s2846_s26 = int_to_ptr.vmem [resolvable:$true] %s2845_s26 }
  0x34   :  { %v566_v57 = vrot.slane %v557_v47, 1  ;;  %v624_v59 = vshrl.u32 %v557_v47, 16  ;;  %1519 = vmatpush.bf16.msra.mxu1 %v3002_v24  ;;  %v627_v62 = vshll.u32 %v557_v47, 16  ;;  %v635_v0 = vshll.u32 %v3931_v50, 16  ;;  %v309_v1 = vld [vmem:[#allocation2 + $0x14] sm:$0x3] }
  0x35   :  { %1568 = vmatpush.bf16.msra.mxu2 %v3098_v25  ;;  %v447_v2 = vrot.slane %v445_v56, 1  ;;  %v2982_v5 = vor.u32 %v3488_v52, %v2979_v53  ;;  %v634_v9 = vrot.slane %v632_v63, 1  ;;  %v401_v11 = vunpack.c.l.b16 %v281_v54  ;;  %v3509_v14 = vld [vmem:[#allocation5 + $0x154] sm:$0xf]  ;;  %v3063_v15 = vld [vmem:[#allocation5 + $0x15c] sm:$0xf0] }
  0x36   :  { %1617 = vmatpush.bf16.msra.mxu3 %v3194_v28  ;;  %v626_v3 = vrot.slane %v624_v59, 1  ;;  %v3939_v7 = vsel %vm565_vm1, %v566_v57, %v567_v58  ;;  %v629_v8 = vrot.slane %v627_v62, 2  ;;  %v637_v10 = vrot.slane %v635_v0, 2  ;;  %v3349_v19 = vld [vmem:[#allocation5 + $0x390] sm:$0xf]  ;;  %v3959_v53 = vld [vmem:[#allocation2 + $0x18] sm:$0xff]  }
  0x37   :  { %1471 = vmatpush.bf16.msra.mxu0 %v2894_v29  ;;  %v550_v12 = vunpack.c.l.b16 %v301_v60  ;;  %v607_v13 = vunpack.c.l.b16 %v309_v1  ;;  %v3942_v16 = vsel %vm436_vm0, %v443_v61, %v447_v2  ;;  %v3582_v20 = vld [vmem:[#allocation5 + $0x398] sm:$0xf0]  ;;  %v3485_v23 = vld [vmem:[#allocation5 + $0x94] sm:$0xf]  ;;  %v2967_v24 = vld [vmem:[#allocation5 + $0x9c] sm:$0xf0]  ;;  %v3066_v26 = vor.u32 %v3509_v14, %v3063_v15 }
  0x38   :  { %1520 = vmatpush.bf16.msra.mxu1 %v2990_v38  ;;  %v630_v17 = vor.u32 %v629_v8, %v626_v3  ;;  %v638_v18 = vor.u32 %v637_v10, %v634_v9  ;;  %v423_v28 = vpack.c.b16 %v401_v11, %v401_v11  ;;  %v452_v29 = vshll.u32 %v3925_v44, 16  ;;  %v3506_v37 = vld [vmem:[#allocation5 + $0x13c] sm:$0xf]  ;;  %v3051_v38 = vld [vmem:[#allocation5 + $0x144] sm:$0xf0]  ;;  %s2847_s29 = sshll.u32 %s4551_s6, 4  ;;  %s2848_s29 = int_to_ptr.hbm [resolvable:$true] %s2847_s29 }
  0x39   :  { %1569 = vmatpush.bf16.msra.mxu2 %v3086_v39  ;;  %v558_v21 = vpack.c.b16 %v4556_v55, %v550_v12  ;;  %v3946_v22 = vpack.c.b16 %v607_v13, %v607_v13  ;;  %v3350_v33 = vor.u32 %v3582_v20, %v3349_v19  ;;  %v2970_v34 = vor.u32 %v3485_v23, %v2967_v24  ;;  %v3337_v39 = vld [vmem:[#allocation5 + $0x378] sm:$0xf]  ;;  %v3579_v40 = vld [vmem:[#allocation5 + $0x380] sm:$0xf0]  ;;  %v3482_v42 = vld [vmem:[#allocation5 + $0x7c] sm:$0xf] }
  0x3a   :  { %1618 = vmatpush.bf16.msra.mxu3 %v3182_v45  ;;  %1472 = vmatmul.bf16.vlgmr.msra.gmra.mxu0 %v3936_v6  ;;  %v3950_v25 = vsel %vm622_vm2, %v630_v17, %v638_v18  ;;  %v457_v41 = vshll.u32 %v423_v28, 16  ;;  %v2955_v43 = vld [vmem:[#allocation5 + $0x84] sm:$0xf0]  ;;  %v450_v45 = vshrl.u32 %v3925_v44, 16  ;;  %v454_v46 = vrot.slane %v452_v29, 1 }
  0x3b   :  { %4580 = vst [vmem:[#allocation16_spill] sm:$0xff] %v3950_v25  ;;  %1521 = vmatmul.bf16.vlgmr.msra.gmra.mxu1 %v3942_v16  ;;  %1660 = vmatpush.bf16.msrb.mxu0 %v3362_v4  ;;  %v641_v30 = vshrl.u32 %v558_v21, 16  ;;  %v644_v31 = vshll.u32 %v558_v21, 16  ;;  %v649_v35 = vshrl.u32 %v3946_v22, 16  ;;  %v652_v36 = vshll.u32 %v3946_v22, 16  ;;  %v3985_v29 = vld [vmem:[#allocation2 + $0x24] sm:$0xff]  }
  0x3c   :  { %1709 = vmatpush.bf16.msrb.mxu1 %v2982_v5  ;;  %1570 = vmatmul.bf16.vlgmr.msra.gmra.mxu2 %v3939_v7  ;;  %v3054_v48 = vor.u32 %v3506_v37, %v3051_v38  ;;  %v302_v54 = vld [vmem:[#allocation2 + $0x18] sm:$0xe]  ;;  %v3338_v56 = vor.u32 %v3579_v40, %v3337_v39  ;;  %v310_v57 = vld [vmem:[#allocation2 + $0x20] sm:$0x3]  ;;  %v2958_v58 = vor.u32 %v3482_v42, %v2955_v43  ;;  %v459_v59 = vrot.slane %v457_v41, 1  ;;  %v3962_v5 = vld [vmem:[#allocation2 + $0xc] sm:$0xff] }
  0x3d   :  { %1758 = vmatpush.bf16.msrb.mxu2 %v3078_v51  ;;  %1619 = vmatmul.bf16.vlgmr.msra.gmra.mxu3 %v3950_v25  ;;  %v643_v47 = vrot.slane %v641_v30, 1  ;;  %v646_v49 = vrot.slane %v644_v31, 2  ;;  %v651_v51 = vrot.slane %v649_v35, 1  ;;  %v654_v52 = vrot.slane %v652_v36, 2  ;;  %v284_v3 = vld [vmem:[#allocation2 + $0x20] sm:$0x1] }
  0x3e   :  { %v570_v60 = vrot.slane %v423_v28, 1  ;;  %v455_v61 = vor.u32 %v454_v46, %v450_v45  ;;  %v569_v62 = vrot.slane %v558_v21, 1  ;;  %v4555_v63 = vunpack.c.h.b16 %v3959_v53  ;;  %v3503_v19 = vld [vmem:[#allocation5 + $0x124] sm:$0xf]  ;;  %v3039_v23 = vld [vmem:[#allocation5 + $0x12c] sm:$0xf0] }
  0x3f   :  { %1661 = vmatpush.bf16.msrb.mxu0 %v3350_v33  ;;  %v551_v0 = vunpack.c.l.b16 %v302_v54  ;;  %v647_v1 = vor.u32 %v646_v49, %v643_v47  ;;  %v655_v2 = vor.u32 %v654_v52, %v651_v51  ;;  %v608_v4 = vunpack.c.l.b16 %v310_v57  ;;  %v3325_v24 = vld [vmem:[#allocation5 + $0x360] sm:$0xf]  ;;  %v3479_v33 = vld [vmem:[#allocation5 + $0x64] sm:$0xf]  ;;  %v311_v38 = vld [vmem:[#allocation2 + $0x2c] sm:$0x3] }
  0x40   :  { %1710 = vmatpush.bf16.msrb.mxu1 %v2970_v34  ;;  %v3965_v8 = vsel %vm436_vm0, %v455_v61, %v459_v59  ;;  %v3968_v9 = vsel %vm565_vm1, %v569_v62, %v570_v60  ;;  %v404_v10 = vunpack.c.l.b16 %v284_v3  ;;  %v464_v15 = vshll.u32 %v3959_v53, 16  ;;  %v2943_v34 = vld [vmem:[#allocation5 + $0x6c] sm:$0xf0]  ;;  %v303_v37 = vld [vmem:[#allocation2 + $0x24] sm:$0xe] }
  0x41   :  { %1759 = vmatpush.bf16.msrb.mxu2 %v3066_v26  ;;  %v559_v11 = vpack.c.b16 %v4555_v63, %v551_v0  ;;  %v3973_v12 = vsel %vm622_vm2, %v647_v1, %v655_v2  ;;  %v3975_v13 = vpack.c.b16 %v608_v4, %v608_v4  ;;  %v3576_v26 = vld [vmem:[#allocation5 + $0x368] sm:$0xf0]  ;;  %v462_v28 = vshrl.u32 %v3959_v53, 16 }
  0x42   :  { %4581 = vst [vmem:[#allocation17_spill] sm:$0xff] %v3973_v12  ;;  %v425_v14 = vpack.c.b16 %v404_v10, %v404_v10  ;;  %v3042_v30 = vor.u32 %v3503_v19, %v3039_v23  ;;  %v3326_v31 = vor.u32 %v3576_v26, %v3325_v24  ;;  %v466_v35 = vrot.slane %v464_v15, 1  ;;  %v287_v57 = vld [vmem:[#allocation2 + $0x2c] sm:$0x1]  ;;  %v2931_v23 = vld [vmem:[#allocation5 + $0x54] sm:$0xf0] }
  0x43   :  { %1662 = vmatpush.bf16.msrb.mxu0 %v3338_v56  ;;  %v658_v17 = vshrl.u32 %v559_v11, 16  ;;  %v661_v18 = vshll.u32 %v559_v11, 16  ;;  %v666_v20 = vshrl.u32 %v3975_v13, 16  ;;  %v669_v21 = vshll.u32 %v3975_v13, 16  ;;  %v3500_v15 = vld [vmem:[#allocation5 + $0x10c] sm:$0xf] }
  0x44   :  { %1711 = vmatpush.bf16.msrb.mxu1 %v2958_v58  ;;  %v469_v36 = vshll.u32 %v425_v14, 16  ;;  %v2946_v39 = vor.u32 %v3479_v33, %v2943_v34  ;;  %v4554_v45 = vunpack.c.h.b16 %v3985_v29  ;;  %v552_v46 = vunpack.c.l.b16 %v303_v37  ;;  %v3988_v58 = vld [vmem:[#allocation2 + $0x18] sm:$0xff]  ;;  %v4011_v33 = vld [vmem:[#allocation2 + $0x30] sm:$0xff]  }
  0x45   :  { %1760 = vmatpush.bf16.msrb.mxu2 %v3054_v48  ;;  %v660_v40 = vrot.slane %v658_v17, 1  ;;  %v663_v41 = vrot.slane %v661_v18, 2  ;;  %v668_v42 = vrot.slane %v666_v20, 1  ;;  %v671_v43 = vrot.slane %v669_v21, 2  ;;  %v3027_v17 = vld [vmem:[#allocation5 + $0x114] sm:$0xf0] }
  0x46   :  { %v609_v47 = vunpack.c.l.b16 %v311_v38  ;;  %v467_v48 = vor.u32 %v466_v35, %v462_v28  ;;  %v471_v49 = vrot.slane %v469_v36, 1  ;;  %v572_v51 = vrot.slane %v559_v11, 1  ;;  %v3313_v18 = vld [vmem:[#allocation5 + $0x348] sm:$0xf]  ;;  %v3573_v20 = vld [vmem:[#allocation5 + $0x350] sm:$0xf0] }
  0x47   :  { %1663 = vmatpush.bf16.msrb.mxu0 %v3326_v31  ;;  %v573_v52 = vrot.slane %v425_v14, 1  ;;  %v664_v54 = vor.u32 %v663_v41, %v660_v40  ;;  %v672_v56 = vor.u32 %v671_v43, %v668_v42  ;;  %v560_v59 = vpack.c.b16 %v4554_v45, %v552_v46  ;;  %v3476_v21 = vld [vmem:[#allocation5 + $0x4c] sm:$0xf]  ;;  %v304_v34 = vld [vmem:[#allocation2 + $0x30] sm:$0xe] }
  0x48   :  { %1712 = vmatpush.bf16.msrb.mxu1 %v2946_v39  ;;  %v3992_v60 = vpack.c.b16 %v609_v47, %v609_v47  ;;  %v3995_v61 = vsel %vm436_vm0, %v467_v48, %v471_v49  ;;  %v407_v0 = vunpack.c.l.b16 %v287_v57  ;;  %v476_v2 = vshll.u32 %v3985_v29, 16  ;;  %v312_v35 = vld [vmem:[#allocation2 + $0x38] sm:$0x3]  ;;  %v3527_v45 = vld [vmem:[#allocation5 + $0x1e4] sm:$0xf] }
  0x49   :  { %1761 = vmatpush.bf16.msrb.mxu2 %v3042_v30  ;;  %v3998_v62 = vsel %vm565_vm1, %v572_v51, %v573_v52  ;;  %v4001_v1 = vsel %vm622_vm2, %v664_v54, %v672_v56  ;;  %v675_v3 = vshrl.u32 %v560_v59, 16  ;;  %v678_v4 = vshll.u32 %v560_v59, 16  ;;  %v290_v52 = vld [vmem:[#allocation2 + $0x38] sm:$0x1]  ;;  %v4014_v54 = vld [vmem:[#allocation2 + $0x24] sm:$0xff] }
  0x4a   :  { %1477 = vmatmul.bf16.gmra.mxu0 %v3962_v5  ;;  %4582 = vst [vmem:[#allocation18_spill] sm:$0xff] %v4001_v1  ;;  %v683_v10 = vshrl.u32 %v3992_v60, 16  ;;  %v686_v11 = vshll.u32 %v3992_v60, 16  ;;  %v427_v14 = vpack.c.b16 %v407_v0, %v407_v0  ;;  %v3030_v19 = vor.u32 %v3500_v15, %v3027_v17 }
  0x4b   :  { %1526 = vmatmul.bf16.gmra.mxu1 %v3965_v8  ;;  %v3314_v24 = vor.u32 %v3573_v20, %v3313_v18  ;;  %v2934_v26 = vor.u32 %v3476_v21, %v2931_v23  ;;  %v474_v28 = vshrl.u32 %v3985_v29, 16  ;;  %v478_v30 = vrot.slane %v476_v2, 1  ;;  %v3497_v18 = vld [vmem:[#allocation5 + $0xf4] sm:$0xf]  ;;  %v3301_v20 = vld [vmem:[#allocation5 + $0x330] sm:$0xf] }
  0x4c   :  { %1575 = vmatmul.bf16.gmra.mxu2 %v3968_v9  ;;  %v481_v31 = vshll.u32 %v427_v14, 16  ;;  %v677_v36 = vrot.slane %v675_v3, 1  ;;  %v680_v37 = vrot.slane %v678_v4, 2  ;;  %v685_v38 = vrot.slane %v683_v10, 1  ;;  %v3570_v23 = vld [vmem:[#allocation5 + $0x338] sm:$0xf0] }
  0x4d   :  { %1624 = vmatmul.bf16.gmra.mxu3 %v3973_v12  ;;  %1762 = vmatpush.bf16.msrb.mxu2 %v3030_v19  ;;  %v688_v39 = vrot.slane %v686_v11, 2  ;;  %v4553_v40 = vunpack.c.h.b16 %v4011_v33  ;;  %v553_v41 = vunpack.c.l.b16 %v304_v34  ;;  %v610_v42 = vunpack.c.l.b16 %v312_v35  ;;  %v3015_v19 = vld [vmem:[#allocation5 + $0xfc] sm:$0xf0]  ;;  %v305_v34 = vld [vmem:[#allocation2 + $0x3c] sm:$0xe] }
  0x4e   :  { %1664 = vmatpush.bf16.msrb.mxu0 %v3314_v24  ;;  %1713 = vmatpush.bf16.msrb.mxu1 %v2934_v26  ;;  %v479_v43 = vor.u32 %v478_v30, %v474_v28  ;;  %v483_v46 = vrot.slane %v481_v31, 1  ;;  %v575_v47 = vrot.slane %v560_v59, 1  ;;  %v576_v48 = vrot.slane %v427_v14, 1  ;;  %v3473_v24 = vld [vmem:[#allocation5 + $0x34] sm:$0xf]  ;;  %v4036_v31 = vld [vmem:[#allocation2 + $0x3c] sm:$0xff]  }
  0x4f   :  { %v681_v49 = vor.u32 %v680_v37, %v677_v36  ;;  %v689_v51 = vor.u32 %v688_v39, %v685_v38  ;;  %v561_v56 = vpack.c.b16 %v4553_v40, %v553_v41  ;;  %v4018_v57 = vpack.c.b16 %v610_v42, %v610_v42  ;;  %v2919_v26 = vld [vmem:[#allocation5 + $0x3c] sm:$0xf0]  ;;  %v313_v38 = vld [vmem:[#allocation2 + $0x44] sm:$0x3] }
  0x50   :  { %v4021_v0 = vsel %vm436_vm0, %v479_v43, %v483_v46  ;;  %v4024_v2 = vsel %vm565_vm1, %v575_v47, %v576_v48  ;;  %v410_v3 = vunpack.c.l.b16 %v290_v52  ;;  %v488_v4 = vshll.u32 %v4011_v33, 16 }
  0x51   :  { %v4027_v59 = vsel %vm622_vm2, %v681_v49, %v689_v51  ;;  %v692_v10 = vshrl.u32 %v561_v56, 16  ;;  %v695_v11 = vshll.u32 %v561_v56, 16  ;;  %v700_v14 = vshrl.u32 %v4018_v57, 16 }
  0x52   :  { %4583 = vst [vmem:[#allocation19_spill] sm:$0xff] %v4027_v59  ;;  %v703_v15 = vshll.u32 %v4018_v57, 16  ;;  %v429_v17 = vpack.c.b16 %v410_v3, %v410_v3  ;;  %v3018_v21 = vor.u32 %v3497_v18, %v3015_v19  ;;  %v3302_v28 = vor.u32 %v3570_v23, %v3301_v20  ;;  %v293_v20 = vld [vmem:[#allocation2 + $0x44] sm:$0x1] }
  0x53   :  { %v2922_v30 = vor.u32 %v3473_v24, %v2919_v26  ;;  %v486_v35 = vshrl.u32 %v4011_v33, 16  ;;  %v490_v36 = vrot.slane %v488_v4, 1  ;;  %v694_v39 = vrot.slane %v692_v10, 1  ;;  %v4040_v4 = vld [vmem:[#allocation2 + $0x30] sm:$0xff]  ;;  %v3536_v24 = vld [vmem:[#allocation5 + $0x22c] sm:$0xf] }
  0x54   :  { %1763 = vmatpush.bf16.msrb.mxu2 %v3018_v21  ;;  %v493_v37 = vshll.u32 %v429_v17, 16  ;;  %1665 = vmatpush.bf16.msrb.mxu0 %v3302_v28  ;;  %v697_v41 = vrot.slane %v695_v11, 2  ;;  %v702_v42 = vrot.slane %v700_v14, 1  ;;  %v705_v43 = vrot.slane %v703_v15, 2  ;;  %v3171_v26 = vld [vmem:[#allocation5 + $0x234] sm:$0xf0] }
  0x55   :  { %1714 = vmatpush.bf16.msrb.mxu1 %v2922_v30  ;;  %v4552_v46 = vunpack.c.h.b16 %v4036_v31  ;;  %v554_v47 = vunpack.c.l.b16 %v305_v34  ;;  %v611_v48 = vunpack.c.l.b16 %v313_v38  ;;  %v491_v49 = vor.u32 %v490_v36, %v486_v35  ;;  %v3003_v38 = vld [vmem:[#allocation5 + $0xe4] sm:$0xf0] }
  0x56   :  { %v495_v51 = vrot.slane %v493_v37, 1  ;;  %v578_v52 = vrot.slane %v561_v56, 1  ;;  %v579_v3 = vrot.slane %v429_v17, 1  ;;  %v698_v18 = vor.u32 %v697_v41, %v694_v39  ;;  %v3494_v37 = vld [vmem:[#allocation5 + $0xdc] sm:$0xf] }
  0x57   :  { %v706_v19 = vor.u32 %v705_v43, %v702_v42  ;;  %v4044_v21 = vpack.c.b16 %v4552_v46, %v554_v47  ;;  %v4046_v10 = vpack.c.b16 %v611_v48, %v611_v48  ;;  %v413_v15 = vunpack.c.l.b16 %v293_v20  ;;  %v3289_v39 = vld [vmem:[#allocation5 + $0x318] sm:$0xf]  ;;  %v3567_v42 = vld [vmem:[#allocation5 + $0x320] sm:$0xf0]  ;;  %v3470_v43 = vld [vmem:[#allocation5 + $0x1c] sm:$0xf] }
  0x58   :  { %v4049_v11 = vsel %vm436_vm0, %v491_v49, %v495_v51  ;;  %v4052_v14 = vsel %vm565_vm1, %v578_v52, %v579_v3  ;;  %v500_v17 = vshll.u32 %v4036_v31, 16  ;;  %v3174_v35 = vor.u32 %v3536_v24, %v3171_v26  ;;  %v2907_v47 = vld [vmem:[#allocation5 + $0x24] sm:$0xf0]  ;;  %v3533_v51 = vld [vmem:[#allocation5 + $0x214] sm:$0xf] }
  0x59   :  { %4584 = vst [vmem:[#allocation20_spill] sm:$0xff] %v4052_v14  ;;  %v4055_v56 = vsel %vm622_vm2, %v698_v18, %v706_v19  ;;  %v709_v23 = vshrl.u32 %v4044_v21, 16  ;;  %v712_v28 = vshll.u32 %v4044_v21, 16  ;;  %v717_v30 = vshrl.u32 %v4046_v10, 16  ;;  %v3159_v52 = vld [vmem:[#allocation5 + $0x21c] sm:$0xf0] }
  0x5a   :  { %1482 = vmatmul.bf16.gmra.mxu0 %v3988_v58  ;;  %4585 = vst [vmem:[#allocation21_spill] sm:$0xff] %v4055_v56  ;;  %v720_v34 = vshll.u32 %v4046_v10, 16  ;;  %v431_v36 = vpack.c.b16 %v413_v15, %v413_v15  ;;  %v3006_v41 = vor.u32 %v3494_v37, %v3003_v38  ;;  %1807 = vmatpush.bf16.msrb.mxu3 %v3174_v35  ;;  %v3530_v3 = vld [vmem:[#allocation5 + $0x1fc] sm:$0xf]  ;;  %v4066_v18 = vld [vmem:[#allocation2 + $0x48] sm:$0xff]   ;;  %v498_v15 = vshrl.u32 %v4036_v31, 16 }
  0x5b   :  { %1531 = vmatmul.bf16.gmra.mxu1 %v3995_v61  ;;  %v3290_v48 = vor.u32 %v3567_v42, %v3289_v39  ;;  %v2910_v49 = vor.u32 %v3470_v43, %v2907_v47  ;;  %v306_v19 = vld [vmem:[#allocation2 + $0x48] sm:$0xe]  ;;  %v3162_v20 = vor.u32 %v3533_v51, %v3159_v52  ;;  %v502_v26 = vrot.slane %v500_v17, 1  ;;  %v314_v35 = vld [vmem:[#allocation2 + $0x50] sm:$0x3] }
  0x5c   :  { %1580 = vmatmul.bf16.gmra.mxu2 %v3998_v62  ;;  %v3147_v24 = vld [vmem:[#allocation5 + $0x204] sm:$0xf0]  ;;  %v505_v46 = vshll.u32 %v431_v36, 16  ;;  %v711_v37 = vrot.slane %v709_v23, 1  ;;  %v714_v38 = vrot.slane %v712_v28, 2  ;;  %v719_v39 = vrot.slane %v717_v30, 1 }
  0x5d   :  { %1629 = vmatmul.bf16.gmra.mxu3 %v4001_v1  ;;  %1764 = vmatpush.bf16.msrb.mxu2 %v3006_v41  ;;  %v722_v42 = vrot.slane %v720_v34, 2  ;;  %v3150_v43 = vor.u32 %v3530_v3, %v3147_v24  ;;  %v4558_v47 = vunpack.c.h.b16 %v4066_v18  ;;  %v555_v40 = vunpack.c.l.b16 %v306_v19  ;;  %v3135_v41 = vld [vmem:[#allocation5 + $0x1ec] sm:$0xf0]  ;;  %v4071_v30 = vld [vmem:[#allocation2 + $0x3c] sm:$0xff]  ;;  %v3524_v19 = vld [vmem:[#allocation5 + $0x1cc] sm:$0xf] }
  0x5e   :  { %1666 = vmatpush.bf16.msrb.mxu0 %v3290_v48  ;;  %1715 = vmatpush.bf16.msrb.mxu1 %v2910_v49  ;;  %v612_v51 = vunpack.c.l.b16 %v314_v35  ;;  %v503_v52 = vor.u32 %v502_v26, %v498_v15  ;;  %v507_v63 = vrot.slane %v505_v46, 1  ;;  %v581_v17 = vrot.slane %v4044_v21, 1  ;;  %v296_v48 = vld [vmem:[#allocation2 + $0x50] sm:$0x1]  ;;  %v3491_v26 = vld [vmem:[#allocation5 + $0xc4] sm:$0xf] }
  0x5f   :  { %1808 = vmatpush.bf16.msrb.mxu3 %v3162_v20  ;;  %v582_v55 = vrot.slane %v431_v36, 1  ;;  %v715_v23 = vor.u32 %v714_v38, %v711_v37  ;;  %v723_v32 = vor.u32 %v722_v42, %v719_v39  ;;  %v3138_v28 = vor.u32 %v3527_v45, %v3135_v41  ;;  %v3123_v20 = vld [vmem:[#allocation5 + $0x1d4] sm:$0xf0]  ;;  %v2991_v37 = vld [vmem:[#allocation5 + $0xcc] sm:$0xf0] }
  0x60   :  { %v4075_v34 = vpack.c.b16 %v4558_v47, %v555_v40  ;;  %v4077_v49 = vpack.c.b16 %v612_v51, %v612_v51  ;;  %v4080_v3 = vsel %vm436_vm0, %v503_v52, %v507_v63  ;;  %v416_v21 = vunpack.c.l.b16 %v296_v48  ;;  %v3277_v35 = vld [vmem:[#allocation5 + $0x300] sm:$0xf]  ;;  %v3564_v39 = vld [vmem:[#allocation5 + $0x308] sm:$0xf0]  ;;  %v3467_v42 = vld [vmem:[#allocation5 + $0x4] sm:$0xf] }
  0x61   :  { %v4083_v46 = vsel %vm565_vm1, %v581_v17, %v582_v55  ;;  %v4086_v36 = vsel %vm622_vm2, %v715_v23, %v723_v32  ;;  %v512_v45 = vshll.u32 %v4066_v18, 16  ;;  %v3126_v24 = vor.u32 %v3524_v19, %v3123_v20  ;;  %v3521_v52 = vld [vmem:[#allocation5 + $0x1b4] sm:$0xf]  ;;  %v3111_v17 = vld [vmem:[#allocation5 + $0x1bc] sm:$0xf0] }
  0x62   :  { %4586 = vst [vmem:[#allocation22_spill] sm:$0xff] %v4083_v46  ;;  %v726_v40 = vshrl.u32 %v4075_v34, 16  ;;  %v729_v55 = vshll.u32 %v4075_v34, 16  ;;  %v734_v63 = vshrl.u32 %v4077_v49, 16  ;;  %v737_v32 = vshll.u32 %v4077_v49, 16 }
  0x63   :  { %1809 = vmatpush.bf16.msrb.mxu3 %v3150_v43  ;;  %4587 = vst [vmem:[#allocation23_spill] sm:$0xff] %v4086_v36  ;;  %v433_v15 = vpack.c.b16 %v416_v21, %v416_v21  ;;  %v2994_v38 = vor.u32 %v3491_v26, %v2991_v37  ;;  %v2895_v43 = vld [vmem:[#allocation5 + $0xc] sm:$0xf0]  ;;  %v3278_v41 = vor.u32 %v3564_v39, %v3277_v35  ;;  %v3518_v23 = vld [vmem:[#allocation5 + $0x19c] sm:$0xf]  ;;  %v510_v48 = vshrl.u32 %v4066_v18, 16 }
  0x64   :  { %v2898_v51 = vor.u32 %v3467_v42, %v2895_v43  ;;  %v3099_v19 = vld [vmem:[#allocation5 + $0x1a4] sm:$0xf0]  ;;  %v514_v20 = vrot.slane %v512_v45, 1  ;;  %v728_v47 = vrot.slane %v726_v40, 1  ;;  %v307_v26 = vld [vmem:[#allocation2 + $0x54] sm:$0xe] }
  0x65   :  { %1765 = vmatpush.bf16.msrb.mxu2 %v2994_v38  ;;  %v517_v21 = vshll.u32 %v433_v15, 16  ;;  %1667 = vmatpush.bf16.msrb.mxu0 %v3278_v41  ;;  %v736_v37 = vrot.slane %v734_v63, 1  ;;  %v739_v35 = vrot.slane %v737_v32, 2  ;;  %v3102_v39 = vor.u32 %v3518_v23, %v3099_v19  ;;  %v315_v42 = vld [vmem:[#allocation2 + $0x5c] sm:$0x3]  ;;  %v4102_v41 = vld [vmem:[#allocation2 + $0x48] sm:$0xff] }
  0x66   :  { %1716 = vmatpush.bf16.msrb.mxu1 %v2898_v51  ;;  %v515_v38 = vor.u32 %v514_v20, %v510_v48  ;;  %v584_v45 = vrot.slane %v4075_v34, 1  ;;  %v299_v1 = vld [vmem:[#allocation2 + $0x5c] sm:$0x1]  ;;  %v613_v12 = vunpack.c.l.b16 %v315_v42  ;;  %v3087_v63 = vld [vmem:[#allocation5 + $0x18c] sm:$0xf0]  ;;  %vm791_vm3 = vcmask 1045504  }
  0x67   :  { %1810 = vmatpush.bf16.msrb.mxu3 %v3138_v28  ;;  %v3114_v28 = vor.u32 %v3521_v52, %v3111_v17  ;;  %v519_v52 = vrot.slane %v517_v21, 1  ;;  %v585_v17 = vrot.slane %v433_v15, 1  ;;  %v419_v34 = vunpack.c.l.b16 %v299_v1  ;;  %v2985_v1 = vld [vmem:[#allocation5 + $0xb0] sm:$0xf]  ;;  %v3490_v21 = vld [vmem:[#allocation5 + $0xb8] sm:$0xf0] }
  0x68   :  { %v4115_v15 = vpack.c.b16 %v613_v12, %v613_v12  ;;  %vm2602_vm4 = vcmask 1041409   ;;  %vm2605_vm5 = vcmask 1042434   ;;  %vm2608_vm6 = vcmask 1043459  }
  0x69   :  { %v4107_v23 = vsel %vm436_vm0, %v515_v38, %v519_v52  ;;  %v4110_v48 = vsel %vm565_vm1, %v584_v45, %v585_v17  ;;  %v435_v20 = vpack.c.b16 %v419_v34, %v419_v34  ;;  %vm2611_vm7 = vcmask 1044484  }
  0x6a   :  { %1487 = vmatmul.bf16.gmra.mxu0 %v4014_v54  ;;  %4588 = vst [vmem:[#allocation24_spill] sm:$0xff] %v4110_v48  ;;  %v751_v12 = vshrl.u32 %v4115_v15, 16  ;;  %vm2614_vm8 = vcmask 1045509   ;;  %vm2617_vm9 = vcmask 1046534   ;;  %vm2620_vm10 = vcmask 1047559  }
  0x6b   :  { %1536 = vmatmul.bf16.gmra.mxu1 %v4021_v0  ;;  %1811 = vmatpush.bf16.msrb.mxu3 %v3126_v24  ;;  %v731_v24 = vrot.slane %v729_v55, 2  ;;  %v3515_v55 = vld [vmem:[#allocation5 + $0x184] sm:$0xf]  ;;  %v529_v38 = vshll.u32 %v435_v20, 16  ;;  %v588_v25 = vrot.slane %v435_v20, 1 }
  0x6c   :  { %1585 = vmatmul.bf16.gmra.mxu2 %v4024_v2  ;;  %v3090_v51 = vor.u32 %v3515_v55, %v3087_v63  ;;  %v753_v17 = vrot.slane %v751_v12, 1  ;;  %v3584_v55 = vld [vmem:[#allocation5 + $0x3ac] sm:$0xf]  ;;  %v3363_v63 = vld [vmem:[#allocation5 + $0x3b4] sm:$0xf0] }
  0x6d   :  { %1634 = vmatmul.bf16.gmra.mxu3 %v4027_v59  ;;  %v732_v40 = vor.u32 %v731_v24, %v728_v47  ;;  %v740_v59 = vor.u32 %v739_v35, %v736_v37  ;;  %v2986_v24 = vor.u32 %v3490_v21, %v2985_v1  ;;  %v3267_v37 = vld [vmem:[#allocation5 + $0x2f4] sm:$0xf0] }
  0x6e   :  { %v2973_v20 = vld [vmem:[#allocation5 + $0x98] sm:$0xf] }
  0x6f   :  { %1812 = vmatpush.bf16.msrb.mxu3 %v3114_v28  ;;  %v4113_v47 = vsel %vm622_vm2, %v732_v40, %v740_v59  ;;  %v3560_v59 = vld [vmem:[#allocation5 + $0x2ec] sm:$0xf]  ;;  %1954 = vmatpush.bf16.msra.mxu2 %v2986_v24 }
  0x70   :  { %4589 = vst [vmem:[#allocation25_spill] sm:$0xff] %v4113_v47  ;;  %v3270_v35 = vor.u32 %v3560_v59, %v3267_v37  ;;  %v4125_v59 = vld [vmem:[#allocation2 + $0x54] sm:$0xff]  ;;  %v3255_v37 = vld [vmem:[#allocation5 + $0x2dc] sm:$0xf0] }
  0x72   :  { %1856 = vmatpush.bf16.msra.mxu0 %v3270_v35 }
  0x73   :  { %1813 = vmatpush.bf16.msrb.mxu3 %v3102_v39 }
  0x77   :  { %1814 = vmatpush.bf16.msrb.mxu3 %v3090_v51  ;;  %v3366_v51 = vor.u32 %v3584_v55, %v3363_v63  ;;  %v317_v63 = vld [vmem:[#allocation2 + $0xc] sm:$0xc] }
  0x79   :  { %1905 = vmatpush.bf16.msra.mxu1 %v3366_v51 }
  0x7a   :  { %1492 = vmatmul.bf16.gmra.mxu0 %v4040_v4 }
  0x7b   :  { %1541 = vmatmul.bf16.gmra.mxu1 %v4049_v11 }
  0x7c   :  { %1590 = vmatmul.bf16.gmra.mxu2 %v4052_v14 }
  0x7d   :  { %1639 = vmatmul.bf16.gmra.mxu3 %v4055_v56  ;;  %v556_v56 = vunpack.c.l.b16 %v307_v26  ;;  %v754_v26 = vshll.u32 %v4115_v15, 16 }
  0x7f   :  { %v756_v40 = vrot.slane %v754_v26, 2  ;;  %v3487_v26 = vld [vmem:[#allocation5 + $0xa0] sm:$0xf0] }
  0x80   :  { %v2974_v24 = vor.u32 %v3487_v26, %v2973_v20 }
  0x81   :  { %v757_v21 = vor.u32 %v756_v40, %v753_v17 }
  0x82   :  { %1955 = vmatpush.bf16.msra.mxu2 %v2974_v24 }
  0x8a   :  { %1497 = vmatmul.bf16.gmra.mxu0 %v4071_v30 }
  0x8b   :  { %1546 = vmatmul.bf16.gmra.mxu1 %v4080_v3 }
  0x8c   :  { %1595 = vmatmul.bf16.gmra.mxu2 %v4083_v46 }
  0x8d   :  { %1644 = vmatmul.bf16.gmra.mxu3 %v4086_v36  ;;  %v4098_v36 = vld [vmem:[#allocation2 + $0x54] sm:$0xff]  }
  0x8e   :  { %v4569_v43 = vunpack.c.h.b16 %v4098_v36  ;;  %v522_v39 = vshrl.u32 %v4098_v36, 16 }
  0x90   :  { %v564_v32 = vpack.c.b16 %v4569_v43, %v556_v56  ;;  %v524_v56 = vshll.u32 %v4098_v36, 16  ;;  %v531_v43 = vrot.slane %v529_v38, 1 }
  0x92   :  { %v743_v28 = vshrl.u32 %v564_v32, 16  ;;  %v746_v19 = vshll.u32 %v564_v32, 16  ;;  %v526_v42 = vrot.slane %v524_v56, 1 }
  0x94   :  { %v745_v52 = vrot.slane %v743_v28, 1  ;;  %v748_v45 = vrot.slane %v746_v19, 2  ;;  %v527_v34 = vor.u32 %v526_v42, %v522_v39  ;;  %v316_v19 = vld [vmem:[#allocation2] sm:$0xc]  ;;  %v3581_v39 = vld [vmem:[#allocation5 + $0x394] sm:$0xf] }
  0x95   :  { %v3351_v42 = vld [vmem:[#allocation5 + $0x39c] sm:$0xf0] }
  0x96   :  { %v749_v1 = vor.u32 %v748_v45, %v745_v52  ;;  %v4128_v56 = vsel %vm436_vm0, %v527_v34, %v531_v43  ;;  %v3557_v43 = vld [vmem:[#allocation5 + $0x2d4] sm:$0xf]  ;;  %v3354_v38 = vor.u32 %v3581_v39, %v3351_v42  ;;  %v793_v45 = vrot.slane %v3931_v50, 2  ;;  %v2961_v34 = vld [vmem:[#allocation5 + $0x80] sm:$0xf] }
  0x97   :  { %v3484_v50 = vld [vmem:[#allocation5 + $0x88] sm:$0xf0]  ;;  %v3578_v39 = vld [vmem:[#allocation5 + $0x37c] sm:$0xf]  ;;  %v3339_v42 = vld [vmem:[#allocation5 + $0x384] sm:$0xf0] }
  0x98   :  { %v4134_v12 = vsel %vm622_vm2, %v749_v1, %v757_v21  ;;  %1906 = vmatpush.bf16.msra.mxu1 %v3354_v38  ;;  %v3554_v1 = vld [vmem:[#allocation5 + $0x2bc] sm:$0xf]  ;;  %v2962_v21 = vor.u32 %v3484_v50, %v2961_v34  ;;  %v3342_v38 = vor.u32 %v3578_v39, %v3339_v42  ;;  %v318_v34 = vld [vmem:[#allocation2 + $0x18] sm:$0xc] }
  0x9a   :  { %1502 = vmatmul.bf16.gmra.mxu0 %v4102_v41  ;;  %1956 = vmatpush.bf16.msra.mxu2 %v2962_v21  ;;  %v2949_v21 = vld [vmem:[#allocation5 + $0x68] sm:$0xf] }
  0x9b   :  { %1551 = vmatmul.bf16.gmra.mxu1 %v4107_v23 }
  0x9c   :  { %1600 = vmatmul.bf16.gmra.mxu2 %v4110_v48  ;;  %1907 = vmatpush.bf16.msra.mxu1 %v3342_v38 }
  0x9d   :  { %1649 = vmatmul.bf16.gmra.mxu3 %v4113_v47  ;;  %v587_v47 = vrot.slane %v564_v32, 1  ;;  %v775_v32 = vunpack.c.l.b16 %v316_v19  ;;  %v3243_v19 = vld [vmem:[#allocation5 + $0x2c4] sm:$0xf0] }
  0x9e   :  { %v3246_v20 = vor.u32 %v3554_v1, %v3243_v19  ;;  %v3481_v19 = vld [vmem:[#allocation5 + $0x70] sm:$0xf0] }
  0x9f   :  { %v4131_v28 = vsel %vm565_vm1, %v587_v47, %v588_v25  ;;  %v3258_v25 = vor.u32 %v3557_v43, %v3255_v37  ;;  %v4591_v47 = vunpack.c.h.b16 %v3912_v27  ;;  %v776_v27 = vunpack.c.l.b16 %v317_v63 }
  0xa0   :  { %4590 = vst [vmem:[#allocation26_spill] sm:$0xff] %v4131_v28  ;;  %v4592_v37 = vunpack.c.h.b16 %v3925_v44 }
  0xa1   :  { %v783_v35 = vpack.c.b16 %v4591_v47, %v775_v32  ;;  %1857 = vmatpush.bf16.msra.mxu0 %v3258_v25 }
  0xa2   :  { %v784_v25 = vpack.c.b16 %v4592_v37, %v776_v27 }
  0xa3   :  { %v792_v52 = vrot.slane %v783_v35, 2 }
  0xa5   :  { %v4144_v40 = vsel %vm791_vm3, %v792_v52, %v793_v45  ;;  %1858 = vmatpush.bf16.msra.mxu0 %v3246_v20  ;;  %v795_v52 = vrot.slane %v784_v25, 2  ;;  %v796_v45 = vrot.slane %v3946_v22, 2  ;;  %v777_v22 = vunpack.c.l.b16 %v318_v34 }
  0xa6   :  { %v2950_v20 = vor.u32 %v3481_v19, %v2949_v21  ;;  %v319_v21 = vld [vmem:[#allocation2 + $0x24] sm:$0xc] }
  0xa7   :  { %v4156_v44 = vsel %vm791_vm3, %v795_v52, %v796_v45  ;;  %v3575_v52 = vld [vmem:[#allocation5 + $0x364] sm:$0xf]  ;;  %v3327_v45 = vld [vmem:[#allocation5 + $0x36c] sm:$0xf0] }
  0xa8   :  { %1957 = vmatpush.bf16.msra.mxu2 %v2950_v20  ;;  %v2937_v20 = vld [vmem:[#allocation5 + $0x50] sm:$0xf] }
  0xaa   :  { %1507 = vmatmul.bf16.gmra.mxu0 %v4125_v59 }
  0xab   :  { %1556 = vmatmul.bf16.gmra.mxu1 %v4128_v56 }
  0xac   :  { %1605 = vmatmul.bf16.gmra.mxu2 %v4131_v28 }
  0xad   :  { %1654 = vmatmul.bf16.gmra.mxu3 %v4134_v12 }
  0xb7   :  { %v1473_v17 = vpop.f32.mrf.mxu0 }
  0xb8   :  { %v1522_v55 = vpop.f32.mrf.mxu1 }
  0xb9   :  { %v1523_v51 = vadd.f32 %v1522_v55, %v1473_v17 }
  0xba   :  { %1668 = vmatmul.bf16.vlgmr.msrb.gmra.mxu0 %v4144_v40 }
  0xbb   :  { %1717 = vmatmul.bf16.vlgmr.msrb.gmra.mxu1 %v3936_v6 }
  0xbc   :  { %1766 = vmatmul.bf16.vlgmr.msrb.gmra.mxu2 %v3942_v16 }
  0xbd   :  { %1815 = vmatmul.bf16.vlgmr.msrb.gmra.mxu3 %v3939_v7 }
  0xbf   :  { %v1571_v32 = vpop.f32.mrf.mxu2  ;;  %v1475_v24 = vpop.f32.mrf.mxu0 }
  0xc0   :  { %v1572_v26 = vadd.f32 %v1571_v32, %v1523_v51  ;;  %v1620_v43 = vpop.f32.mrf.mxu3  ;;  %v1524_v6 = vpop.f32.mrf.mxu1  ;;  %v3551_v32 = vld [vmem:[#allocation5 + $0x2a4] sm:$0xf] }
  0xc1   :  { %v1525_v35 = vadd.f32 %v1524_v6, %v1475_v24 }
  0xc2   :  { %v4152_v47 = vadd.f32 %v1620_v43, %v1572_v26  ;;  %v3231_v26 = vld [vmem:[#allocation5 + $0x2ac] sm:$0xf0] }
  0xc3   :  { %v3234_v24 = vor.u32 %v3551_v32, %v3231_v26  ;;  %v3478_v26 = vld [vmem:[#allocation5 + $0x58] sm:$0xf0] }
  0xc5   :  { %1859 = vmatpush.bf16.msra.mxu0 %v3234_v24  ;;  %v2938_v24 = vor.u32 %v3478_v26, %v2937_v20  ;;  %v320_v20 = vld [vmem:[#allocation2 + $0x30] sm:$0xc] }
  0xc7   :  { %v1573_v17 = vpop.f32.mrf.mxu2  ;;  %v1478_v51 = vpop.f32.mrf.mxu0  ;;  %1958 = vmatpush.bf16.msra.mxu2 %v2938_v24  ;;  %v2925_v24 = vld [vmem:[#allocation5 + $0x38] sm:$0xf] }
  0xc8   :  { %v1574_v55 = vadd.f32 %v1573_v17, %v1525_v35  ;;  %v1622_v63 = vpop.f32.mrf.mxu3  ;;  %v1527_v27 = vpop.f32.mrf.mxu1  ;;  %v4593_v35 = vunpack.c.h.b16 %v3959_v53  ;;  %v3330_v17 = vor.u32 %v3575_v52, %v3327_v45 }
  0xc9   :  { %v1528_v1 = vadd.f32 %v1527_v27, %v1478_v51 }
  0xca   :  { %v4158_v50 = vadd.f32 %v1622_v63, %v1574_v55  ;;  %1673 = vmatmul.bf16.gmra.mxu0 %v4156_v44  ;;  %v785_v39 = vpack.c.b16 %v4593_v35, %v777_v22  ;;  %v799_v63 = vrot.slane %v3975_v13, 2  ;;  %1908 = vmatpush.bf16.msra.mxu1 %v3330_v17  ;;  %v778_v13 = vunpack.c.l.b16 %v319_v21 }
  0xcb   :  { %1722 = vmatmul.bf16.gmra.mxu1 %v3962_v5 }
  0xcc   :  { %1771 = vmatmul.bf16.gmra.mxu2 %v3965_v8  ;;  %v798_v55 = vrot.slane %v785_v39, 2 }
  0xcd   :  { %1820 = vmatmul.bf16.gmra.mxu3 %v3968_v9 }
  0xce   :  { %v4170_v53 = vsel %vm791_vm3, %v798_v55, %v799_v63  ;;  %v3572_v55 = vld [vmem:[#allocation5 + $0x34c] sm:$0xf]  ;;  %v3315_v63 = vld [vmem:[#allocation5 + $0x354] sm:$0xf0] }
  0xcf   :  { %v1576_v43 = vpop.f32.mrf.mxu2  ;;  %v1480_v6 = vpop.f32.mrf.mxu0 }
  0xd0   :  { %v1577_v37 = vadd.f32 %v1576_v43, %v1528_v1  ;;  %v1625_v25 = vpop.f32.mrf.mxu3  ;;  %v1529_v5 = vpop.f32.mrf.mxu1  ;;  %v3548_v43 = vld [vmem:[#allocation5 + $0x28c] sm:$0xf] }
  0xd1   :  { %v1530_v38 = vadd.f32 %v1529_v5, %v1480_v6 }
  0xd2   :  { %v4166_v42 = vadd.f32 %v1625_v25, %v1577_v37  ;;  %v3219_v37 = vld [vmem:[#allocation5 + $0x294] sm:$0xf0] }
  0xd3   :  { %v3222_v6 = vor.u32 %v3548_v43, %v3219_v37  ;;  %v3475_v37 = vld [vmem:[#allocation5 + $0x40] sm:$0xf0] }
  0xd5   :  { %1860 = vmatpush.bf16.msra.mxu0 %v3222_v6  ;;  %v2926_v6 = vor.u32 %v3475_v37, %v2925_v24  ;;  %v321_v24 = vld [vmem:[#allocation2 + $0x3c] sm:$0xc] }
  0xd7   :  { %v1578_v51 = vpop.f32.mrf.mxu2  ;;  %v1483_v1 = vpop.f32.mrf.mxu0  ;;  %1959 = vmatpush.bf16.msra.mxu2 %v2926_v6  ;;  %v3081_v6 = vld [vmem:[#allocation5 + $0x170] sm:$0xf] }
  0xd8   :  { %v1579_v27 = vadd.f32 %v1578_v51, %v1530_v38  ;;  %v1627_v34 = vpop.f32.mrf.mxu3  ;;  %v1532_v22 = vpop.f32.mrf.mxu1  ;;  %v4594_v38 = vunpack.c.h.b16 %v3985_v29  ;;  %v3318_v51 = vor.u32 %v3572_v55, %v3315_v63 }
  0xd9   :  { %v1533_v32 = vadd.f32 %v1532_v22, %v1483_v1 }
  0xda   :  { %v4172_v19 = vadd.f32 %v1627_v34, %v1579_v27  ;;  %1678 = vmatmul.bf16.gmra.mxu0 %v4170_v53  ;;  %v786_v52 = vpack.c.b16 %v4594_v38, %v778_v13  ;;  %v802_v34 = vrot.slane %v3992_v60, 2  ;;  %1909 = vmatpush.bf16.msra.mxu1 %v3318_v51  ;;  %v779_v60 = vunpack.c.l.b16 %v320_v20 }
  0xdb   :  { %1727 = vmatmul.bf16.gmra.mxu1 %v3988_v58 }
  0xdc   :  { %1776 = vmatmul.bf16.gmra.mxu2 %v3995_v61  ;;  %v801_v27 = vrot.slane %v786_v52, 2 }
  0xdd   :  { %1825 = vmatmul.bf16.gmra.mxu3 %v3998_v62 }
  0xde   :  { %v4184_v29 = vsel %vm791_vm3, %v801_v27, %v802_v34  ;;  %v3569_v27 = vld [vmem:[#allocation5 + $0x334] sm:$0xf]  ;;  %v3303_v34 = vld [vmem:[#allocation5 + $0x33c] sm:$0xf0] }
  0xdf   :  { %v1581_v25 = vpop.f32.mrf.mxu2  ;;  %v1485_v5 = vpop.f32.mrf.mxu0 }
  0xe0   :  { %v1582_v35 = vadd.f32 %v1581_v25, %v1533_v32  ;;  %v1630_v39 = vpop.f32.mrf.mxu3  ;;  %v1534_v58 = vpop.f32.mrf.mxu1  ;;  %v3545_v25 = vld [vmem:[#allocation5 + $0x274] sm:$0xf] }
  0xe1   :  { %v1535_v17 = vadd.f32 %v1534_v58, %v1485_v5 }
  0xe2   :  { %v4180_v45 = vadd.f32 %v1630_v39, %v1582_v35  ;;  %v3207_v35 = vld [vmem:[#allocation5 + $0x27c] sm:$0xf0] }
  0xe3   :  { %v3210_v5 = vor.u32 %v3545_v25, %v3207_v35  ;;  %v3514_v35 = vld [vmem:[#allocation5 + $0x178] sm:$0xf0] }
  0xe5   :  { %1861 = vmatpush.bf16.msra.mxu0 %v3210_v5  ;;  %v2913_v5 = vld [vmem:[#allocation5 + $0x20] sm:$0xf] }
  0xe7   :  { %v1583_v1 = vpop.f32.mrf.mxu2  ;;  %v1488_v32 = vpop.f32.mrf.mxu0 }
  0xe8   :  { %v1584_v22 = vadd.f32 %v1583_v1, %v1535_v17  ;;  %v1632_v21 = vpop.f32.mrf.mxu3  ;;  %v1537_v13 = vpop.f32.mrf.mxu1  ;;  %v4595_v17 = vunpack.c.h.b16 %v4011_v33  ;;  %v3306_v1 = vor.u32 %v3569_v27, %v3303_v34  ;;  %v3511_v27 = vld [vmem:[#allocation5 + $0x160] sm:$0xf0] }
  0xe9   :  { %v1538_v43 = vadd.f32 %v1537_v13, %v1488_v32 }
  0xea   :  { %v4186_v26 = vadd.f32 %v1632_v21, %v1584_v22  ;;  %1683 = vmatmul.bf16.gmra.mxu0 %v4184_v29  ;;  %v787_v55 = vpack.c.b16 %v4595_v17, %v779_v60  ;;  %v805_v21 = vrot.slane %v4018_v57, 2  ;;  %1910 = vmatpush.bf16.msra.mxu1 %v3306_v1  ;;  %v780_v57 = vunpack.c.l.b16 %v321_v24  ;;  %v3195_v17 = vld [vmem:[#allocation5 + $0x264] sm:$0xf0] }
  0xeb   :  { %1732 = vmatmul.bf16.gmra.mxu1 %v4014_v54  ;;  %v3291_v24 = vld [vmem:[#allocation5 + $0x324] sm:$0xf0] }
  0xec   :  { %1781 = vmatmul.bf16.gmra.mxu2 %v4021_v0  ;;  %v804_v22 = vrot.slane %v787_v55, 2 }
  0xed   :  { %1830 = vmatmul.bf16.gmra.mxu3 %v4024_v2 }
  0xee   :  { %v4198_v33 = vsel %vm791_vm3, %v804_v22, %v805_v21 }
  0xef   :  { %v1586_v39 = vpop.f32.mrf.mxu2  ;;  %v1490_v58 = vpop.f32.mrf.mxu0  ;;  %4596 = vst [vmem:[#allocation27_spill] sm:$0xff] %v4198_v33 }
  0xf0   :  { %v1587_v38 = vadd.f32 %v1586_v39, %v1538_v43  ;;  %v1635_v52 = vpop.f32.mrf.mxu3  ;;  %v1539_v54 = vpop.f32.mrf.mxu1  ;;  %v3082_v39 = vor.u32 %v3514_v35, %v3081_v6  ;;  %v3057_v6 = vld [vmem:[#allocation5 + $0x140] sm:$0xf] }
  0xf1   :  { %v1540_v51 = vadd.f32 %v1539_v54, %v1490_v58 }
  0xf2   :  { %v4194_v63 = vadd.f32 %v1635_v52, %v1587_v38  ;;  %v3472_v38 = vld [vmem:[#allocation5 + $0x28] sm:$0xf0]  ;;  %v3542_v52 = vld [vmem:[#allocation5 + $0x25c] sm:$0xf]  ;;  %2003 = vmatpush.bf16.msra.mxu3 %v3082_v39 }
  0xf3   :  { %v2914_v58 = vor.u32 %v3472_v38, %v2913_v5  ;;  %v3198_v54 = vor.u32 %v3542_v52, %v3195_v17  ;;  %v3508_v39 = vld [vmem:[#allocation5 + $0x148] sm:$0xf0]  ;;  %v3505_v52 = vld [vmem:[#allocation5 + $0x130] sm:$0xf0] }
  0xf4   :  { %v3058_v38 = vor.u32 %v3508_v39, %v3057_v6  ;;  %v3183_v6 = vld [vmem:[#allocation5 + $0x24c] sm:$0xf0] }
  0xf5   :  { %1960 = vmatpush.bf16.msra.mxu2 %v2914_v58  ;;  %1862 = vmatpush.bf16.msra.mxu0 %v3198_v54 }
  0xf7   :  { %v1588_v32 = vpop.f32.mrf.mxu2  ;;  %v1493_v43 = vpop.f32.mrf.mxu0 }
  0xf8   :  { %v1589_v13 = vadd.f32 %v1588_v32, %v1540_v51  ;;  %v1637_v20 = vpop.f32.mrf.mxu3  ;;  %v1542_v60 = vpop.f32.mrf.mxu1  ;;  %v3069_v51 = vld [vmem:[#allocation5 + $0x158] sm:$0xf] }
  0xf9   :  { %v1543_v25 = vadd.f32 %v1542_v60, %v1493_v43  ;;  %v3070_v32 = vor.u32 %v3511_v27, %v3069_v51  ;;  %v3566_v60 = vld [vmem:[#allocation5 + $0x31c] sm:$0xf] }
  0xfa   :  { %v4200_v37 = vadd.f32 %v1637_v20, %v1589_v13  ;;  %1688 = vmatmul.bf16.gmra.mxu0 %v4198_v33  ;;  %v3294_v35 = vor.u32 %v3566_v60, %v3291_v24  ;;  %v3539_v60 = vld [vmem:[#allocation5 + $0x244] sm:$0xf] }
  0xfb   :  { %1737 = vmatmul.bf16.gmra.mxu1 %v4040_v4  ;;  %v4597_v4 = vunpack.c.h.b16 %v4036_v31  ;;  %2004 = vmatpush.bf16.msra.mxu3 %v3070_v32  ;;  %v3186_v39 = vor.u32 %v3539_v60, %v3183_v6  ;;  %v3493_v60 = vld [vmem:[#allocation5 + $0xd0] sm:$0xf0] }
  0xfc   :  { %1786 = vmatmul.bf16.gmra.mxu2 %v4049_v11  ;;  %1911 = vmatpush.bf16.msra.mxu1 %v3294_v35 }
  0xfd   :  { %1835 = vmatmul.bf16.gmra.mxu3 %v4052_v14  ;;  %v788_v21 = vpack.c.b16 %v4597_v4, %v780_v57  ;;  %v3045_v57 = vld [vmem:[#allocation5 + $0x128] sm:$0xf]  ;;  %v3502_v4 = vld [vmem:[#allocation5 + $0x118] sm:$0xf0]  ;;  %1863 = vmatpush.bf16.msra.mxu0 %v3186_v39 }
  0xfe   :  { %v3046_v51 = vor.u32 %v3505_v52, %v3045_v57 }
  0xff   :  { %v1591_v55 = vpop.f32.mrf.mxu2  ;;  %v1495_v22 = vpop.f32.mrf.mxu0  ;;  %v807_v5 = vrot.slane %v788_v21, 2  ;;  %2005 = vmatpush.bf16.msra.mxu3 %v3058_v38 }
 0x100   :  { %v1592_v34 = vadd.f32 %v1591_v55, %v1543_v25  ;;  %v1640_v1 = vpop.f32.mrf.mxu3  ;;  %v1544_v13 = vpop.f32.mrf.mxu1  ;;  %v808_v25 = vrot.slane %v4046_v10, 2  ;;  %v3033_v10 = vld [vmem:[#allocation5 + $0x110] sm:$0xf] }
 0x101   :  { %v1545_v43 = vadd.f32 %v1544_v13, %v1495_v22  ;;  %v3034_v32 = vor.u32 %v3502_v4, %v3033_v10  ;;  %v2901_v13 = vld [vmem:[#allocation5 + $0x8] sm:$0xf]  ;;  %v3009_v10 = vld [vmem:[#allocation5 + $0xe0] sm:$0xf] }
 0x102   :  { %v4208_v20 = vadd.f32 %v1640_v1, %v1592_v34  ;;  %v4212_v54 = vsel %vm791_vm3, %v807_v5, %v808_v25  ;;  %v322_v34 = vld [vmem:[#allocation2 + $0x48] sm:$0xc]  ;;  %v3021_v5 = vld [vmem:[#allocation5 + $0xf8] sm:$0xf]  ;;  %v3499_v25 = vld [vmem:[#allocation5 + $0x100] sm:$0xf0] }
 0x103   :  { %4598 = vst [vmem:[#allocation28_spill] sm:$0xff] %v4212_v54  ;;  %2006 = vmatpush.bf16.msra.mxu3 %v3046_v51  ;;  %v781_v21 = vunpack.c.l.b16 %v322_v34  ;;  %v3279_v34 = vld [vmem:[#allocation5 + $0x30c] sm:$0xf0] }
 0x107   :  { %v1593_v31 = vpop.f32.mrf.mxu2  ;;  %v1498_v55 = vpop.f32.mrf.mxu0  ;;  %2007 = vmatpush.bf16.msra.mxu3 %v3034_v32  ;;  %v3496_v32 = vld [vmem:[#allocation5 + $0xe8] sm:$0xf0] }
 0x108   :  { %v1594_v58 = vadd.f32 %v1593_v31, %v1545_v43  ;;  %v1642_v17 = vpop.f32.mrf.mxu3  ;;  %v1547_v27 = vpop.f32.mrf.mxu1  ;;  %v3469_v43 = vld [vmem:[#allocation5 + $0x10] sm:$0xf0] }
 0x109   :  { %v1548_v22 = vadd.f32 %v1547_v27, %v1498_v55  ;;  %v2902_v24 = vor.u32 %v3469_v43, %v2901_v13  ;;  %v3563_v27 = vld [vmem:[#allocation5 + $0x304] sm:$0xf]  ;;  %v3010_v43 = vor.u32 %v3496_v32, %v3009_v10 }
 0x10a   :  { %v4214_v1 = vadd.f32 %v1642_v17, %v1594_v58  ;;  %1693 = vmatmul.bf16.gmra.mxu0 %v4212_v54  ;;  %v3022_v58 = vor.u32 %v3499_v25, %v3021_v5  ;;  %v3282_v4 = vor.u32 %v3563_v27, %v3279_v34 }
 0x10b   :  { %1742 = vmatmul.bf16.gmra.mxu1 %v4071_v30  ;;  %v4599_v30 = vunpack.c.h.b16 %v4066_v18  ;;  %1961 = vmatpush.bf16.msra.mxu2 %v2902_v24 }
 0x10c   :  { %1791 = vmatmul.bf16.gmra.mxu2 %v4080_v3  ;;  %2008 = vmatpush.bf16.msra.mxu3 %v3022_v58  ;;  %v3177_v58 = vld [vmem:[#allocation5 + $0x230] sm:$0xf] }
 0x10d   :  { %1840 = vmatmul.bf16.gmra.mxu3 %v4083_v46  ;;  %v789_v52 = vpack.c.b16 %v4599_v30, %v781_v21  ;;  %1912 = vmatpush.bf16.msra.mxu1 %v3282_v4  ;;  %v2997_v21 = vld [vmem:[#allocation5 + $0xc8] sm:$0xf]  ;;  %v3369_v30 = vld [vmem:[#allocation5 + $0x3b0] sm:$0xf] }
 0x10e   :  { %v2998_v5 = vor.u32 %v3493_v60, %v2997_v21  ;;  %v3273_v21 = vld [vmem:[#allocation5 + $0x2f0] sm:$0xf]  ;;  %v3562_v60 = vld [vmem:[#allocation5 + $0x2f8] sm:$0xf0] }
 0x10f   :  { %v1596_v35 = vpop.f32.mrf.mxu2  ;;  %v1500_v57 = vpop.f32.mrf.mxu0  ;;  %v810_v13 = vrot.slane %v789_v52, 2  ;;  %v3586_v52 = vld [vmem:[#allocation5 + $0x3b8] sm:$0xf0] }
 0x110   :  { %v1597_v38 = vadd.f32 %v1596_v35, %v1548_v22  ;;  %v1645_v31 = vpop.f32.mrf.mxu3  ;;  %v1549_v17 = vpop.f32.mrf.mxu1  ;;  %v811_v22 = vrot.slane %v4077_v49, 2  ;;  %2009 = vmatpush.bf16.msra.mxu3 %v3010_v43 }
 0x111   :  { %v1550_v51 = vadd.f32 %v1549_v17, %v1500_v57  ;;  %v3370_v17 = vor.u32 %v3586_v52, %v3369_v30 }
 0x112   :  { %v4222_v55 = vadd.f32 %v1645_v31, %v1597_v38  ;;  %v4226_v39 = vsel %vm791_vm3, %v810_v13, %v811_v22  ;;  %v323_v38 = vld [vmem:[#allocation2 + $0x54] sm:$0xc]  ;;  %v4600_v13 = vunpack.c.h.b16 %v4098_v36 }
 0x113   :  { %v782_v49 = vunpack.c.l.b16 %v323_v38  ;;  %2150 = vmatpush.bf16.msrb.mxu2 %v3370_v17 }
 0x114   :  { %2010 = vmatpush.bf16.msra.mxu3 %v2998_v5 }
 0x115   :  { %v790_v22 = vpack.c.b16 %v4600_v13, %v782_v49 }
 0x117   :  { %v1598_v18 = vpop.f32.mrf.mxu2  ;;  %v1503_v35 = vpop.f32.mrf.mxu0 }
 0x118   :  { %v1599_v24 = vadd.f32 %v1598_v18, %v1550_v51  ;;  %v1647_v6 = vpop.f32.mrf.mxu3  ;;  %v1552_v25 = vpop.f32.mrf.mxu1  ;;  %v3538_v51 = vld [vmem:[#allocation5 + $0x238] sm:$0xf0] }
 0x119   :  { %v1553_v57 = vadd.f32 %v1552_v25, %v1503_v35  ;;  %v3178_v34 = vor.u32 %v3538_v51, %v3177_v58  ;;  %v814_v35 = vrot.slane %v4115_v15, 2 }
 0x11a   :  { %v4228_v31 = vadd.f32 %v1647_v6, %v1599_v24  ;;  %1698 = vmatmul.bf16.gmra.mxu0 %v4226_v39  ;;  %v3274_v24 = vor.u32 %v3562_v60, %v3273_v21  ;;  %v813_v6 = vrot.slane %v790_v22, 2  ;;  %v3583_v21 = vld [vmem:[#allocation5 + $0x3a0] sm:$0xf0]  ;;  %v3165_v60 = vld [vmem:[#allocation5 + $0x218] sm:$0xf] }
 0x11b   :  { %1747 = vmatmul.bf16.gmra.mxu1 %v4102_v41  ;;  %2052 = vmatpush.bf16.msrb.mxu0 %v3178_v34 }
 0x11c   :  { %1796 = vmatmul.bf16.gmra.mxu2 %v4107_v23  ;;  %2101 = vmatpush.bf16.msrb.mxu1 %v3274_v24  ;;  %v4240_v36 = vsel %vm791_vm3, %v813_v6, %v814_v35  ;;  %v3535_v35 = vld [vmem:[#allocation5 + $0x220] sm:$0xf0] }
 0x11d   :  { %1845 = vmatmul.bf16.gmra.mxu3 %v4110_v48 }
 0x11f   :  { %v1601_v27 = vpop.f32.mrf.mxu2  ;;  %v1505_v32 = vpop.f32.mrf.mxu0 }
 0x120   :  { %v1602_v10 = vadd.f32 %v1601_v27, %v1553_v57  ;;  %v1650_v4 = vpop.f32.mrf.mxu3  ;;  %v1554_v41 = vpop.f32.mrf.mxu1 }
 0x121   :  { %v1555_v18 = vadd.f32 %v1554_v41, %v1505_v32 }
 0x122   :  { %v4236_v43 = vadd.f32 %v1650_v4, %v1602_v10 }
 0x127   :  { %v1603_v5 = vpop.f32.mrf.mxu2  ;;  %v1508_v57 = vpop.f32.mrf.mxu0 }
 0x128   :  { %v1604_v25 = vadd.f32 %v1603_v5, %v1555_v18  ;;  %v1652_v38 = vpop.f32.mrf.mxu3  ;;  %v1557_v49 = vpop.f32.mrf.mxu1  ;;  %v3261_v5 = vld [vmem:[#allocation5 + $0x2d8] sm:$0xf] }
 0x129   :  { %v1558_v52 = vadd.f32 %v1557_v49, %v1508_v57  ;;  %v3166_v57 = vor.u32 %v3535_v35, %v3165_v60 }
 0x12a   :  { %v4242_v30 = vadd.f32 %v1652_v38, %v1604_v25  ;;  %1703 = vmatmul.bf16.gmra.mxu0 %v4240_v36  ;;  %v3559_v25 = vld [vmem:[#allocation5 + $0x2e0] sm:$0xf0]  ;;  %v4601_v38 = vld [vmem:[#allocation16_spill] sm:$0xff] }
 0x12b   :  { %1752 = vmatmul.bf16.gmra.mxu1 %v4125_v59  ;;  %v3357_v59 = vld [vmem:[#allocation5 + $0x398] sm:$0xf]  ;;  %v3262_v49 = vor.u32 %v3559_v25, %v3261_v5  ;;  %2053 = vmatpush.bf16.msrb.mxu0 %v3166_v57 }
 0x12c   :  { %1801 = vmatmul.bf16.gmra.mxu2 %v4128_v56  ;;  %v3358_v6 = vor.u32 %v3583_v21, %v3357_v59 }
 0x12d   :  { %1850 = vmatmul.bf16.gmra.mxu3 %v4131_v28  ;;  %2102 = vmatpush.bf16.msrb.mxu1 %v3262_v49  ;;  %v3652_v49 = vld [vmem:[#allocation2 + $0xc] sm:$0xff] }
 0x12e   :  { %2151 = vmatpush.bf16.msrb.mxu2 %v3358_v6 }
 0x12f   :  { %v1606_v15 = vpop.f32.mrf.mxu2  ;;  %v1510_v51 = vpop.f32.mrf.mxu0 }
 0x130   :  { %v1607_v58 = vadd.f32 %v1606_v15, %v1558_v52  ;;  %v1655_v17 = vpop.f32.mrf.mxu3  ;;  %v1559_v27 = vpop.f32.mrf.mxu1  ;;  %v3651_v52 = vld [vmem:[#allocation2] sm:$0xff] }
 0x131   :  { %v1560_v10 = vadd.f32 %v1559_v27, %v1510_v51  ;;  %v4256_v15 = vld [vmem:[#allocation8] sm:$0xff]  ;;  %v4258_v27 = vld [vmem:[#allocation8 + $0x18] sm:$0xff] }
 0x132   :  { %v4248_v34 = vadd.f32 %v1655_v17, %v1607_v58 }
 0x137   :  { %v1608_v4 = vpop.f32.mrf.mxu2  ;;  %v1669_v22 = vpop.f32.mrf.mxu0 }
 0x138   :  { %v1609_v32 = vadd.f32 %v1608_v4, %v1560_v10  ;;  %v1657_v13 = vpop.f32.mrf.mxu3  ;;  %v1670_v41 = vadd.f32 %v1669_v22, %v4152_v47  ;;  %v1718_v18 = vpop.f32.mrf.mxu1 }
 0x13a   :  { %v4251_v24 = vadd.f32 %v1657_v13, %v1609_v32  ;;  %1864 = vmatmul.bf16.vlgmr.msra.gmra.mxu0 %v4601_v38  ;;  %v2205_v13 = vadd.f32 %v4256_v15, %v1670_v41  ;;  %v3345_v41 = vld [vmem:[#allocation5 + $0x380] sm:$0xf] }
 0x13b   :  { %1913 = vmatmul.bf16.vlgmr.msra.gmra.mxu1 %v4144_v40 }
 0x13c   :  { %1962 = vmatmul.bf16.vlgmr.msra.gmra.mxu2 %v3651_v52  ;;  %v3580_v52 = vld [vmem:[#allocation5 + $0x388] sm:$0xf0] }
 0x13d   :  { %2011 = vmatmul.bf16.vlgmr.msra.gmra.mxu3 %v3942_v16 }
 0x13f   :  { %v1767_v47 = vpop.f32.mrf.mxu2  ;;  %v1671_v51 = vpop.f32.mrf.mxu0 }
 0x140   :  { %v1768_v58 = vadd.f32 %v1767_v47, %v1718_v18  ;;  %v1816_v17 = vpop.f32.mrf.mxu3  ;;  %v1672_v10 = vadd.f32 %v1671_v51, %v4158_v50  ;;  %v1720_v4 = vpop.f32.mrf.mxu1  ;;  %v4602_v50 = vld [vmem:[#allocation17_spill] sm:$0xff]  ;;  %v3153_v47 = vld [vmem:[#allocation5 + $0x200] sm:$0xf] }
 0x141   :  { %v3249_v51 = vld [vmem:[#allocation5 + $0x2c0] sm:$0xf] }
 0x142   :  { %v4261_v32 = vadd.f32 %v1816_v17, %v1768_v58  ;;  %v2208_v16 = vadd.f32 %v4258_v27, %v1672_v10  ;;  %v3346_v58 = vor.u32 %v3580_v52, %v3345_v41  ;;  %v3532_v17 = vld [vmem:[#allocation5 + $0x208] sm:$0xf0] }
 0x143   :  { %v3556_v10 = vld [vmem:[#allocation5 + $0x2c8] sm:$0xf0] }
 0x144   :  { %v2253_v22 = vmax.f32 %v2205_v13, %v2208_v16  ;;  %v3154_v13 = vor.u32 %v3532_v17, %v3153_v47  ;;  %v3250_v16 = vor.u32 %v3556_v10, %v3249_v51  ;;  %2152 = vmatpush.bf16.msrb.mxu2 %v3346_v58 }
 0x146   :  { %v2254_v59 = vrot.slane %v2253_v22, 4  ;;  %2054 = vmatpush.bf16.msrb.mxu0 %v3154_v13  ;;  %2103 = vmatpush.bf16.msrb.mxu1 %v3250_v16 }
 0x147   :  { %v1769_v21 = vpop.f32.mrf.mxu2  ;;  %v1674_v35 = vpop.f32.mrf.mxu0 }
 0x148   :  { %v1770_v60 = vadd.f32 %v1769_v21, %v1720_v4  ;;  %v1818_v6 = vpop.f32.mrf.mxu3  ;;  %v1675_v18 = vadd.f32 %v1674_v35, %v4166_v42  ;;  %v1723_v5 = vpop.f32.mrf.mxu1  ;;  %v2255_v57 = vmax.f32 %v2253_v22, %v2254_v59 }
 0x14a   :  { %v4266_v25 = vadd.f32 %v1818_v6, %v1770_v60  ;;  %1869 = vmatmul.bf16.gmra.mxu0 %v4602_v50  ;;  %v2256_v42 = vrot.slane %v2255_v57, 2 }
 0x14b   :  { %1918 = vmatmul.bf16.gmra.mxu1 %v4156_v44 }
 0x14c   :  { %1967 = vmatmul.bf16.gmra.mxu2 %v3652_v49  ;;  %v2257_v35 = vmax.f32 %v2255_v57, %v2256_v42  ;;  %v2211_v49 = vadd.f32 %v4256_v15, %v1675_v18 }
 0x14d   :  { %2016 = vmatmul.bf16.gmra.mxu3 %v3965_v8 }
 0x14e   :  { %v2258_v28 = vrot.slane %v2257_v35, 1 }
 0x14f   :  { %v1772_v4 = vpop.f32.mrf.mxu2  ;;  %v1676_v21 = vpop.f32.mrf.mxu0 }
 0x150   :  { %v1773_v22 = vadd.f32 %v1772_v4, %v1723_v5  ;;  %v1821_v59 = vpop.f32.mrf.mxu3  ;;  %v1677_v60 = vadd.f32 %v1676_v21, %v4172_v19  ;;  %v1725_v6 = vpop.f32.mrf.mxu1  ;;  %v4276_v5 = vld [vmem:[#allocation7] sm:$0x7]  ;;  %v2259_v57 = vmax.f32 %v2257_v35, %v2258_v28  ;;  %v3553_v28 = vld [vmem:[#allocation5 + $0x2b0] sm:$0xf0] }
 0x151   :  { %v4282_v18 = vperm.slane %v4276_v5, 0 }
 0x152   :  { %v4272_v8 = vadd.f32 %v1821_v59, %v1773_v22  ;;  %v2214_v41 = vadd.f32 %v4258_v27, %v1677_v60  ;;  %v4603_v22 = vld [vmem:[#allocation18_spill] sm:$0xff]  ;;  %v3653_v59 = vld [vmem:[#allocation2 + $0x18] sm:$0xff]  ;;  %v3333_v60 = vld [vmem:[#allocation5 + $0x368] sm:$0xf] }
 0x153   :  { %v2429_v35 = vadd.f32 %v4282_v18, %v2259_v57 }
 0x154   :  { %v2274_v52 = vmax.f32 %v2211_v49, %v2214_v41  ;;  %v3529_v41 = vld [vmem:[#allocation5 + $0x1f0] sm:$0xf0] }
 0x156   :  { %v2275_v47 = vrot.slane %v2274_v52, 4 }
 0x157   :  { %v1774_v17 = vpop.f32.mrf.mxu2  ;;  %v1679_v10 = vpop.f32.mrf.mxu0 }
 0x158   :  { %v1775_v51 = vadd.f32 %v1774_v17, %v1725_v6  ;;  %v1823_v58 = vpop.f32.mrf.mxu3  ;;  %v2276_v19 = vmax.f32 %v2274_v52, %v2275_v47  ;;  %v1680_v4 = vadd.f32 %v1679_v10, %v4180_v45  ;;  %v1728_v13 = vpop.f32.mrf.mxu1  ;;  %v3577_v6 = vld [vmem:[#allocation5 + $0x370] sm:$0xf0]  ;;  %v3141_v45 = vld [vmem:[#allocation5 + $0x1e8] sm:$0xf] }
 0x159   :  { %v3334_v49 = vor.u32 %v3577_v6, %v3333_v60  ;;  %v3237_v52 = vld [vmem:[#allocation5 + $0x2a8] sm:$0xf]  ;;  %v2453_v60 = vmax.f32 %v2429_v35, 0.0 }
 0x15a   :  { %v4279_v16 = vadd.f32 %v1823_v58, %v1775_v51  ;;  %v2277_v42 = vrot.slane %v2276_v19, 2  ;;  %1874 = vmatmul.bf16.gmra.mxu0 %v4603_v22  ;;  %v3142_v51 = vor.u32 %v3529_v41, %v3141_v45  ;;  %v3238_v58 = vor.u32 %v3553_v28, %v3237_v52 }
 0x15b   :  { %1923 = vmatmul.bf16.gmra.mxu1 %v4170_v53  ;;  %2153 = vmatpush.bf16.msrb.mxu2 %v3334_v49  ;;  %v2217_v57 = vadd.f32 %v4256_v15, %v1680_v4  ;;  %v2477_v52 = vpack.c.bf16 %v2453_v60, %v2453_v60  ;;  %v3654_v60 = vld [vmem:[#allocation2 + $0x24] sm:$0xff] }
 0x15c   :  { %1972 = vmatmul.bf16.gmra.mxu2 %v3653_v59  ;;  %v2278_v21 = vmax.f32 %v2276_v19, %v2277_v42  ;;  %2055 = vmatpush.bf16.msrb.mxu0 %v3142_v51 }
 0x15d   :  { %2021 = vmatmul.bf16.gmra.mxu3 %v3995_v61  ;;  %2104 = vmatpush.bf16.msrb.mxu1 %v3238_v58  ;;  %v2577_v4 = vunpack.c.l.b16 %v2477_v52  ;;  %v3550_v52 = vld [vmem:[#allocation5 + $0x298] sm:$0xf0] }
 0x15e   :  { %v2279_v47 = vrot.slane %v2278_v21, 1 }
 0x15f   :  { %v1777_v17 = vpop.f32.mrf.mxu2  ;;  %v1681_v46 = vpop.f32.mrf.mxu0 }
 0x160   :  { %v1778_v10 = vadd.f32 %v1777_v17, %v1728_v13  ;;  %v1826_v48 = vpop.f32.mrf.mxu3  ;;  %v2280_v19 = vmax.f32 %v2278_v21, %v2279_v47  ;;  %v1682_v61 = vadd.f32 %v1681_v46, %v4186_v26  ;;  %v1730_v42 = vpop.f32.mrf.mxu1 }
 0x162   :  { %v4289_v59 = vadd.f32 %v1826_v48, %v1778_v10  ;;  %v2432_v6 = vadd.f32 %v4282_v18, %v2280_v19  ;;  %v2220_v45 = vadd.f32 %v4258_v27, %v1682_v61  ;;  %v4604_v61 = vld [vmem:[#allocation19_spill] sm:$0xff] }
 0x164   :  { %v2456_v41 = vmax.f32 %v2432_v6, 0.0  ;;  %v2295_v13 = vmax.f32 %v2217_v57, %v2220_v45  ;;  %v3321_v57 = vld [vmem:[#allocation5 + $0x350] sm:$0xf] }
 0x165   :  { %v3129_v45 = vld [vmem:[#allocation5 + $0x1d0] sm:$0xf] }
 0x166   :  { %v2480_v28 = vpack.c.bf16 %v2456_v41, %v2456_v41  ;;  %v2296_v49 = vrot.slane %v2295_v13, 4 }
 0x167   :  { %v1779_v21 = vpop.f32.mrf.mxu2  ;;  %v1684_v26 = vpop.f32.mrf.mxu0 }
 0x168   :  { %v1780_v47 = vadd.f32 %v1779_v21, %v1730_v42  ;;  %v1828_v46 = vpop.f32.mrf.mxu3  ;;  %v2580_v17 = vunpack.c.l.b16 %v2480_v28  ;;  %v2297_v51 = vmax.f32 %v2295_v13, %v2296_v49  ;;  %v1685_v48 = vadd.f32 %v1684_v26, %v4194_v63  ;;  %v1733_v35 = vpop.f32.mrf.mxu1  ;;  %v3574_v63 = vld [vmem:[#allocation5 + $0x358] sm:$0xf0]  ;;  %v3225_v28 = vld [vmem:[#allocation5 + $0x290] sm:$0xf] }
 0x169   :  { %v3322_v41 = vor.u32 %v3574_v63, %v3321_v57  ;;  %v3526_v13 = vld [vmem:[#allocation5 + $0x1d8] sm:$0xf0] }
 0x16a   :  { %v4295_v58 = vadd.f32 %v1828_v46, %v1780_v47  ;;  %v2601_v10 = vrot.slane %v2580_v17, 7  ;;  %v2298_v19 = vrot.slane %v2297_v51, 2  ;;  %1879 = vmatmul.bf16.gmra.mxu0 %v4604_v61  ;;  %v3130_v47 = vor.u32 %v3526_v13, %v3129_v45 }
 0x16b   :  { %1928 = vmatmul.bf16.gmra.mxu1 %v4184_v29  ;;  %v3226_v46 = vor.u32 %v3550_v52, %v3225_v28  ;;  %2154 = vmatpush.bf16.msrb.mxu2 %v3322_v41 }
 0x16c   :  { %1977 = vmatmul.bf16.gmra.mxu2 %v3654_v60  ;;  %v2603_v42 = vsel %vm2602_vm4, %v2601_v10, %v2577_v4  ;;  %v2299_v6 = vmax.f32 %v2297_v51, %v2298_v19  ;;  %2056 = vmatpush.bf16.msrb.mxu0 %v3130_v47  ;;  %v2223_v19 = vadd.f32 %v4256_v15, %v1685_v48  ;;  %v3309_v48 = vld [vmem:[#allocation5 + $0x338] sm:$0xf] }
 0x16d   :  { %2026 = vmatmul.bf16.gmra.mxu3 %v4021_v0  ;;  %2105 = vmatpush.bf16.msrb.mxu1 %v3226_v46 }
 0x16e   :  { %v2300_v49 = vrot.slane %v2299_v6, 1 }
 0x16f   :  { %v1782_v21 = vpop.f32.mrf.mxu2  ;;  %v1686_v14 = vpop.f32.mrf.mxu0 }
 0x170   :  { %v1783_v26 = vadd.f32 %v1782_v21, %v1733_v35  ;;  %v1831_v17 = vpop.f32.mrf.mxu3  ;;  %v2301_v60 = vmax.f32 %v2299_v6, %v2300_v49  ;;  %v1687_v51 = vadd.f32 %v1686_v14, %v4200_v37  ;;  %v1735_v4 = vpop.f32.mrf.mxu1 }
 0x172   :  { %v4302_v0 = vadd.f32 %v1831_v17, %v1783_v26  ;;  %v2435_v10 = vadd.f32 %v4282_v18, %v2301_v60  ;;  %v2226_v57 = vadd.f32 %v4258_v27, %v1687_v51  ;;  %v4605_v26 = vld [vmem:[#allocation21_spill] sm:$0xff]  ;;  %v3655_v60 = vld [vmem:[#allocation2 + $0x30] sm:$0xff] }
 0x173   :  { %v3571_v17 = vld [vmem:[#allocation5 + $0x340] sm:$0xf0] }
 0x174   :  { %v2459_v63 = vmax.f32 %v2435_v10, 0.0  ;;  %v2316_v45 = vmax.f32 %v2223_v19, %v2226_v57  ;;  %v3310_v51 = vor.u32 %v3571_v17, %v3309_v48  ;;  %v3523_v10 = vld [vmem:[#allocation5 + $0x1c0] sm:$0xf0]  ;;  %v3213_v19 = vld [vmem:[#allocation5 + $0x278] sm:$0xf] }
 0x176   :  { %v2483_v35 = vpack.c.bf16 %v2459_v63, %v2459_v63  ;;  %v2317_v13 = vrot.slane %v2316_v45, 4  ;;  %2155 = vmatpush.bf16.msrb.mxu2 %v3310_v51 }
 0x177   :  { %v1784_v28 = vpop.f32.mrf.mxu2  ;;  %v1689_v52 = vpop.f32.mrf.mxu0 }
 0x178   :  { %v1785_v41 = vadd.f32 %v1784_v28, %v1735_v4  ;;  %v1833_v6 = vpop.f32.mrf.mxu3  ;;  %v2583_v14 = vunpack.c.l.b16 %v2483_v35  ;;  %v2318_v37 = vmax.f32 %v2316_v45, %v2317_v13  ;;  %v1738_v49 = vpop.f32.mrf.mxu1  ;;  %v3117_v4 = vld [vmem:[#allocation5 + $0x1b8] sm:$0xf]  ;;  %v3547_v35 = vld [vmem:[#allocation5 + $0x280] sm:$0xf0] }
 0x179   :  { %v3118_v45 = vor.u32 %v3523_v10, %v3117_v4  ;;  %v3214_v13 = vor.u32 %v3547_v35, %v3213_v19 }
 0x17a   :  { %v4307_v21 = vadd.f32 %v1833_v6, %v1785_v41  ;;  %v2604_v47 = vrot.slane %v2583_v14, 6  ;;  %v2319_v46 = vrot.slane %v2318_v37, 2  ;;  %1884 = vmatmul.bf16.gmra.mxu0 %v4605_v26  ;;  %v1690_v41 = vadd.f32 %v1689_v52, %v4208_v20 }
 0x17b   :  { %1933 = vmatmul.bf16.gmra.mxu1 %v4198_v33  ;;  %2057 = vmatpush.bf16.msrb.mxu0 %v3118_v45 }
 0x17c   :  { %1982 = vmatmul.bf16.gmra.mxu2 %v3655_v60  ;;  %v2606_v57 = vsel %vm2605_vm5, %v2604_v47, %v2603_v42  ;;  %v2320_v63 = vmax.f32 %v2318_v37, %v2319_v46  ;;  %2106 = vmatpush.bf16.msrb.mxu1 %v3214_v13  ;;  %v2229_v47 = vadd.f32 %v4256_v15, %v1690_v41  ;;  %v3297_v41 = vld [vmem:[#allocation5 + $0x320] sm:$0xf] }
 0x17d   :  { %2031 = vmatmul.bf16.gmra.mxu3 %v4049_v11 }
 0x17e   :  { %v2321_v28 = vrot.slane %v2320_v63, 1 }
 0x17f   :  { %v1787_v6 = vpop.f32.mrf.mxu2  ;;  %v1691_v48 = vpop.f32.mrf.mxu0 }
 0x180   :  { %v1788_v14 = vadd.f32 %v1787_v6, %v1738_v49  ;;  %v1836_v60 = vpop.f32.mrf.mxu3  ;;  %v2322_v17 = vmax.f32 %v2320_v63, %v2321_v28  ;;  %v1692_v33 = vadd.f32 %v1691_v48, %v4214_v1  ;;  %v1740_v42 = vpop.f32.mrf.mxu1  ;;  %v4606_v6 = vld [vmem:[#allocation23_spill] sm:$0xff]  ;;  %v3105_v48 = vld [vmem:[#allocation5 + $0x1a0] sm:$0xf] }
 0x182   :  { %v4315_v37 = vadd.f32 %v1836_v60, %v1788_v14  ;;  %v2438_v11 = vadd.f32 %v4282_v18, %v2322_v17  ;;  %v2232_v46 = vadd.f32 %v4258_v27, %v1692_v33  ;;  %v3568_v33 = vld [vmem:[#allocation5 + $0x328] sm:$0xf0]  ;;  %v3656_v14 = vld [vmem:[#allocation2 + $0x3c] sm:$0xff] }
 0x183   :  { %v3298_v60 = vor.u32 %v3568_v33, %v3297_v41  ;;  %v3520_v17 = vld [vmem:[#allocation5 + $0x1a8] sm:$0xf0] }
 0x184   :  { %v2462_v51 = vmax.f32 %v2438_v11, 0.0  ;;  %v2337_v20 = vmax.f32 %v2229_v47, %v2232_v46  ;;  %v3106_v46 = vor.u32 %v3520_v17, %v3105_v48 }
 0x185   :  { %2156 = vmatpush.bf16.msrb.mxu2 %v3298_v60 }
 0x186   :  { %v2486_v52 = vpack.c.bf16 %v2462_v51, %v2462_v51  ;;  %v2338_v4 = vrot.slane %v2337_v20, 4  ;;  %v3544_v51 = vld [vmem:[#allocation5 + $0x268] sm:$0xf0]  ;;  %2058 = vmatpush.bf16.msrb.mxu0 %v3106_v46  ;;  %v3565_v46 = vld [vmem:[#allocation5 + $0x310] sm:$0xf0] }
 0x187   :  { %v1789_v49 = vpop.f32.mrf.mxu2  ;;  %v1694_v63 = vpop.f32.mrf.mxu0 }
 0x188   :  { %v4320_v10 = vadd.f32 %v1789_v49, %v1740_v42  ;;  %v4322_v19 = vpop.f32.mrf.mxu3  ;;  %v2586_v1 = vunpack.c.l.b16 %v2486_v52  ;;  %v2339_v45 = vmax.f32 %v2337_v20, %v2338_v4  ;;  %v1743_v35 = vpop.f32.mrf.mxu1  ;;  %v3201_v42 = vld [vmem:[#allocation5 + $0x260] sm:$0xf]  ;;  %v1695_v4 = vadd.f32 %v1694_v63, %v4222_v55 }
 0x189   :  { %v3202_v20 = vor.u32 %v3544_v51, %v3201_v42 }
 0x18a   :  { %v2607_v13 = vrot.slane %v2586_v1, 5  ;;  %v2340_v28 = vrot.slane %v2339_v45, 2  ;;  %1889 = vmatmul.bf16.gmra.mxu0 %v4606_v6 }
 0x18b   :  { %1938 = vmatmul.bf16.gmra.mxu1 %v4212_v54 }
 0x18c   :  { %1987 = vmatmul.bf16.gmra.mxu2 %v3656_v14  ;;  %v2609_v11 = vsel %vm2608_vm6, %v2607_v13, %v2606_v57  ;;  %v2341_v47 = vmax.f32 %v2339_v45, %v2340_v28  ;;  %2107 = vmatpush.bf16.msrb.mxu1 %v3202_v20  ;;  %v3602_v45 = vld [vmem:[#allocation10 + $0x38] sm:$0xff]  ;;  %v2235_v28 = vadd.f32 %v4256_v15, %v1695_v4  ;;  %v3517_v4 = vld [vmem:[#allocation5 + $0x190] sm:$0xf0] }
 0x18d   :  { %2036 = vmatmul.bf16.gmra.mxu3 %v4080_v3 }
 0x18e   :  { %v2342_v52 = vrot.slane %v2341_v47, 1  ;;  %2800 = vmatpush.bf16.msrb.mxu3 %v3602_v45  ;;  %v3541_v45 = vld [vmem:[#allocation5 + $0x250] sm:$0xf0] }
 0x18f   :  { %v1792_v49 = vpop.f32.mrf.mxu2  ;;  %v1696_v41 = vpop.f32.mrf.mxu0 }
 0x190   :  { %v1793_v1 = vadd.f32 %v1792_v49, %v1743_v35  ;;  %v1841_v14 = vpop.f32.mrf.mxu3  ;;  %v2343_v33 = vmax.f32 %v2341_v47, %v2342_v52  ;;  %v1697_v54 = vadd.f32 %v1696_v41, %v4228_v31  ;;  %v1745_v57 = vpop.f32.mrf.mxu1  ;;  %v3601_v35 = vld [vmem:[#allocation10 + $0x30] sm:$0xff] }
 0x191   :  { %v3285_v47 = vld [vmem:[#allocation5 + $0x308] sm:$0xf] }
 0x192   :  { %v4330_v13 = vadd.f32 %v1841_v14, %v1793_v1  ;;  %v2441_v3 = vadd.f32 %v4282_v18, %v2343_v33  ;;  %v2238_v60 = vadd.f32 %v4258_v27, %v1697_v54  ;;  %2801 = vmatpush.bf16.msrb.mxu3 %v3601_v35  ;;  %v3286_v52 = vor.u32 %v3565_v46, %v3285_v47  ;;  %v3093_v49 = vld [vmem:[#allocation5 + $0x188] sm:$0xf] }
 0x193   :  { %v3189_v1 = vld [vmem:[#allocation5 + $0x248] sm:$0xf]  ;;  %v3094_v33 = vor.u32 %v3517_v4, %v3093_v49 }
 0x194   :  { %v2465_v55 = vmax.f32 %v2441_v3, 0.0  ;;  %v2358_v63 = vmax.f32 %v2235_v28, %v2238_v60  ;;  %v3600_v3 = vld [vmem:[#allocation10 + $0x28] sm:$0xff]  ;;  %2157 = vmatpush.bf16.msrb.mxu2 %v3286_v52  ;;  %v3190_v28 = vor.u32 %v3541_v45, %v3189_v1  ;;  %v3657_v35 = vld [vmem:[#allocation2 + $0x48] sm:$0xff] }
 0x195   :  { %2059 = vmatpush.bf16.msrb.mxu0 %v3094_v33 }
 0x196   :  { %v2489_v48 = vpack.c.bf16 %v2465_v55, %v2465_v55  ;;  %v2359_v17 = vrot.slane %v2358_v63, 4  ;;  %2802 = vmatpush.bf16.msrb.mxu3 %v3600_v3  ;;  %2108 = vmatpush.bf16.msrb.mxu1 %v3190_v28  ;;  %v3597_v28 = vld [vmem:[#allocation10 + $0x10] sm:$0xff] }
 0x197   :  { %v1794_v42 = vpop.f32.mrf.mxu2  ;;  %v1699_v20 = vpop.f32.mrf.mxu0 }
 0x198   :  { %v4335_v31 = vadd.f32 %v1794_v42, %v1745_v57  ;;  %v4337_v51 = vpop.f32.mrf.mxu3  ;;  %v2589_v54 = vunpack.c.l.b16 %v2489_v48  ;;  %v2360_v14 = vmax.f32 %v2358_v63, %v2359_v17  ;;  %v1748_v41 = vpop.f32.mrf.mxu1  ;;  %v4607_v57 = vld [vmem:[#allocation25_spill] sm:$0xff]  ;;  %v3599_v63 = vld [vmem:[#allocation10 + $0x20] sm:$0xff]  ;;  %v1700_v47 = vadd.f32 %v1699_v20, %v4236_v43 }
 0x19a   :  { %v2610_v60 = vrot.slane %v2589_v54, 4  ;;  %v2361_v55 = vrot.slane %v2360_v14, 2  ;;  %1894 = vmatmul.bf16.gmra.mxu0 %v4607_v57  ;;  %2803 = vmatpush.bf16.msrb.mxu3 %v3599_v63 }
 0x19b   :  { %1943 = vmatmul.bf16.gmra.mxu1 %v4226_v39 }
 0x19c   :  { %1992 = vmatmul.bf16.gmra.mxu2 %v3657_v35  ;;  %v2362_v42 = vmax.f32 %v2360_v14, %v2361_v55  ;;  %v2612_v48 = vsel %vm2611_vm7, %v2610_v60, %v2609_v11  ;;  %v3598_v14 = vld [vmem:[#allocation10 + $0x18] sm:$0xff]  ;;  %v2241_v11 = vadd.f32 %v4256_v15, %v1700_v47 }
 0x19d   :  { %2041 = vmatmul.bf16.gmra.mxu3 %v4107_v23 }
 0x19e   :  { %v2363_v17 = vrot.slane %v2362_v42, 1  ;;  %2804 = vmatpush.bf16.msrb.mxu3 %v3598_v14 }
 0x19f   :  { %v1797_v46 = vpop.f32.mrf.mxu2  ;;  %v1701_v4 = vpop.f32.mrf.mxu0 }
 0x1a0   :  { %v1798_v52 = vadd.f32 %v1797_v46, %v1748_v41  ;;  %v1846_v49 = vpop.f32.mrf.mxu3  ;;  %v2364_v1 = vmax.f32 %v2362_v42, %v2363_v17  ;;  %v1702_v54 = vadd.f32 %v1701_v4, %v4242_v30  ;;  %v1750_v45 = vpop.f32.mrf.mxu1  ;;  %v3658_v4 = vld [vmem:[#allocation2 + $0x54] sm:$0xff] }
 0x1a2   :  { %v4345_v3 = vadd.f32 %v1846_v49, %v1798_v52  ;;  %v2444_v23 = vadd.f32 %v4282_v18, %v2364_v1  ;;  %v2244_v33 = vadd.f32 %v4258_v27, %v1702_v54  ;;  %2805 = vmatpush.bf16.msrb.mxu3 %v3597_v28  ;;  %v3596_v52 = vld [vmem:[#allocation10 + $0x8] sm:$0xff]  ;;  %v3595_v54 = vld [vmem:[#allocation10] sm:$0xff] }
 0x1a4   :  { %v2468_v43 = vmax.f32 %v2444_v23, 0.0  ;;  %v2379_v20 = vmax.f32 %v2241_v11, %v2244_v33 }
 0x1a6   :  { %v2492_v41 = vpack.c.bf16 %v2468_v43, %v2468_v43  ;;  %v2380_v60 = vrot.slane %v2379_v20, 4  ;;  %2806 = vmatpush.bf16.msrb.mxu3 %v3596_v52 }
 0x1a7   :  { %v1799_v55 = vpop.f32.mrf.mxu2  ;;  %v1704_v42 = vpop.f32.mrf.mxu0 }
 0x1a8   :  { %v4350_v35 = vadd.f32 %v1799_v55, %v1750_v45  ;;  %v4352_v30 = vpop.f32.mrf.mxu3  ;;  %v2592_v63 = vunpack.c.l.b16 %v2492_v41  ;;  %v2381_v17 = vmax.f32 %v2379_v20, %v2380_v60  ;;  %v1753_v46 = vpop.f32.mrf.mxu1  ;;  %v1705_v23 = vadd.f32 %v1704_v42, %v4248_v34 }
 0x1aa   :  { %v2613_v47 = vrot.slane %v2592_v63, 3  ;;  %v2382_v49 = vrot.slane %v2381_v17, 2  ;;  %1899 = vmatmul.bf16.gmra.mxu0 %v4134_v12  ;;  %2807 = vmatpush.bf16.msrb.mxu3 %v3595_v54 }
 0x1ab   :  { %1948 = vmatmul.bf16.gmra.mxu1 %v4240_v36 }
 0x1ac   :  { %1997 = vmatmul.bf16.gmra.mxu2 %v3658_v4  ;;  %v2383_v1 = vmax.f32 %v2381_v17, %v2382_v49  ;;  %v2615_v45 = vsel %vm2614_vm8, %v2613_v47, %v2612_v48 }
 0x1ad   :  { %2046 = vmatmul.bf16.gmra.mxu3 %v4128_v56  ;;  %v2247_v56 = vadd.f32 %v4256_v15, %v1705_v23 }
 0x1ae   :  { %v2384_v14 = vrot.slane %v2383_v1, 1 }
 0x1af   :  { %v1802_v11 = vpop.f32.mrf.mxu2  ;;  %v1706_v20 = vpop.f32.mrf.mxu0 }
 0x1b0   :  { %v1803_v33 = vadd.f32 %v1802_v11, %v1753_v46  ;;  %v1851_v43 = vpop.f32.mrf.mxu3  ;;  %v2385_v28 = vmax.f32 %v2383_v1, %v2384_v14  ;;  %v1707_v41 = vadd.f32 %v1706_v20, %v4251_v24  ;;  %v1755_v60 = vpop.f32.mrf.mxu1 }
 0x1b2   :  { %v4360_v55 = vadd.f32 %v1851_v43, %v1803_v33  ;;  %v2447_v63 = vadd.f32 %v4282_v18, %v2385_v28  ;;  %v2250_v48 = vadd.f32 %v4258_v27, %v1707_v41 }
 0x1b4   :  { %v2471_v17 = vmax.f32 %v2447_v63, 0.0  ;;  %v2400_v52 = vmax.f32 %v2247_v56, %v2250_v48 }
 0x1b6   :  { %v2495_v34 = vpack.c.bf16 %v2471_v17, %v2471_v17  ;;  %v2401_v42 = vrot.slane %v2400_v52, 4  ;;  %v4375_v17 = vld [vmem:[#allocation8 + $0x8] sm:$0xff] }
 0x1b7   :  { %v1804_v47 = vpop.f32.mrf.mxu2  ;;  %v1865_v4 = vpop.f32.mrf.mxu0 }
 0x1b8   :  { %v1805_v46 = vadd.f32 %v1804_v47, %v1755_v60  ;;  %v1853_v49 = vpop.f32.mrf.mxu3  ;;  %v2595_v1 = vunpack.c.l.b16 %v2495_v34  ;;  %v2402_v54 = vmax.f32 %v2400_v52, %v2401_v42  ;;  %v1866_v24 = vadd.f32 %v1865_v4, %v4261_v32  ;;  %v1914_v14 = vpop.f32.mrf.mxu1 }
 0x1ba   :  { %v4366_v11 = vadd.f32 %v1853_v49, %v1805_v46  ;;  %v2616_v33 = vrot.slane %v2595_v1, 2  ;;  %v2403_v15 = vrot.slane %v2402_v54, 2  ;;  %v1915_v23 = vadd.f32 %v1914_v14, %v1866_v24  ;;  %2060 = vmatmul.bf16.vlgmr.msrb.gmra.mxu0 %v3939_v7  ;;  %v4377_v7 = vld [vmem:[#allocation8 + $0x20] sm:$0xff] }
 0x1bb   :  { %2109 = vmatmul.bf16.vlgmr.msrb.gmra.mxu1 %v4601_v38 }
 0x1bc   :  { %2158 = vmatmul.bf16.vlgmr.msrb.gmra.mxu2 %v4144_v40  ;;  %v2404_v27 = vmax.f32 %v2402_v54, %v2403_v15  ;;  %v2618_v43 = vsel %vm2617_vm9, %v2616_v33, %v2615_v45  ;;  %v2206_v45 = vadd.f32 %v4375_v17, %v1915_v23 }
 0x1be   :  { %v2405_v20 = vrot.slane %v2404_v27, 1 }
 0x1bf   :  { %v1963_v28 = vpop.f32.mrf.mxu2  ;;  %v1867_v32 = vpop.f32.mrf.mxu0 }
 0x1c0   :  { %v2012_v41 = vpop.f32.mrf.mxu3  ;;  %v2406_v60 = vmax.f32 %v2404_v27, %v2405_v20  ;;  %v1868_v56 = vadd.f32 %v1867_v32, %v4266_v25  ;;  %v1916_v48 = vpop.f32.mrf.mxu1 }
 0x1c1   :  { %v4372_v63 = vadd.f32 %v2012_v41, %v1963_v28 }
 0x1c2   :  { %v2450_v38 = vadd.f32 %v4282_v18, %v2406_v60  ;;  %v1917_v40 = vadd.f32 %v1916_v48, %v1868_v56 }
 0x1c4   :  { %v2474_v52 = vmax.f32 %v2450_v38, 0.0  ;;  %v2209_v34 = vadd.f32 %v4377_v7, %v1917_v40 }
 0x1c6   :  { %v2498_v42 = vpack.c.bf16 %v2474_v52, %v2474_v52  ;;  %v2260_v47 = vmax.f32 %v2206_v45, %v2209_v34 }
 0x1c7   :  { %v1965_v46 = vpop.f32.mrf.mxu2  ;;  %v1870_v4 = vpop.f32.mrf.mxu0 }
 0x1c8   :  { %v2014_v49 = vpop.f32.mrf.mxu3  ;;  %v2598_v1 = vunpack.c.l.b16 %v2498_v42  ;;  %v2261_v25 = vrot.slane %v2260_v47, 4  ;;  %v1871_v24 = vadd.f32 %v1870_v4, %v4272_v8  ;;  %v1919_v14 = vpop.f32.mrf.mxu1 }
 0x1c9   :  { %v4382_v54 = vadd.f32 %v2014_v49, %v1965_v46 }
 0x1ca   :  { %v2619_v18 = vrot.slane %v2598_v1, 1  ;;  %v1920_v33 = vadd.f32 %v1919_v14, %v1871_v24  ;;  %2065 = vmatmul.bf16.gmra.mxu0 %v3968_v9  ;;  %v2262_v15 = vmax.f32 %v2260_v47, %v2261_v25  ;;  %v4399_v1 = vperm.slane %v4276_v5, 1 }
 0x1cb   :  { %2114 = vmatmul.bf16.gmra.mxu1 %v4602_v50 }
 0x1cc   :  { %2163 = vmatmul.bf16.gmra.mxu2 %v4156_v44  ;;  %v2621_v23 = vsel %vm2620_vm10, %v2619_v18, %v2618_v43  ;;  %v2263_v28 = vrot.slane %v2262_v15, 2  ;;  %v2212_v38 = vadd.f32 %v4375_v17, %v1920_v33 }
 0x1cd   :  { %v2650_v27 = vpack.c.b16 %v2621_v23, %v2621_v23 }
 0x1ce   :  { %v2264_v9 = vmax.f32 %v2262_v15, %v2263_v28 }
 0x1cf   :  { %v1968_v20 = vpop.f32.mrf.mxu2  ;;  %v1872_v32 = vpop.f32.mrf.mxu0  ;;  %2808 = vmatmul.bf16.vlgmr.msrb.gmra.mxu3 %v2650_v27 }
 0x1d0   :  { %v2017_v41 = vpop.f32.mrf.mxu3  ;;  %v1873_v60 = vadd.f32 %v1872_v32, %v4279_v16  ;;  %v1921_v56 = vpop.f32.mrf.mxu1  ;;  %v2265_v43 = vrot.slane %v2264_v9, 1 }
 0x1d1   :  { %v4389_v8 = vadd.f32 %v2017_v41, %v1968_v20 }
 0x1d2   :  { %v1922_v48 = vadd.f32 %v1921_v56, %v1873_v60  ;;  %v2266_v4 = vmax.f32 %v2264_v9, %v2265_v43 }
 0x1d4   :  { %v2215_v50 = vadd.f32 %v4377_v7, %v1922_v48  ;;  %v2430_v18 = vadd.f32 %v4399_v1, %v2266_v4 }
 0x1d6   :  { %v2281_v44 = vmax.f32 %v2212_v38, %v2215_v50  ;;  %v2454_v28 = vmax.f32 %v2430_v18, 0.0 }
 0x1d7   :  { %v1970_v40 = vpop.f32.mrf.mxu2  ;;  %v1875_v45 = vpop.f32.mrf.mxu0 }
 0x1d8   :  { %v2019_v52 = vpop.f32.mrf.mxu3  ;;  %v2282_v34 = vrot.slane %v2281_v44, 4  ;;  %v1876_v47 = vadd.f32 %v1875_v45, %v4289_v59  ;;  %v1924_v46 = vpop.f32.mrf.mxu1  ;;  %v2478_v48 = vpack.c.bf16 %v2454_v28, %v2454_v28 }
 0x1d9   :  { %v4394_v42 = vadd.f32 %v2019_v52, %v1970_v40 }
 0x1da   :  { %v2283_v49 = vmax.f32 %v2281_v44, %v2282_v34  ;;  %v1925_v16 = vadd.f32 %v1924_v46, %v1876_v47  ;;  %2070 = vmatmul.bf16.gmra.mxu0 %v3998_v62  ;;  %v2578_v47 = vunpack.c.l.b16 %v2478_v48  ;;  %v4608_v48 = vld [vmem:[#allocation20_spill] sm:$0xff] }
 0x1db   :  { %2119 = vmatmul.bf16.gmra.mxu1 %v4603_v22 }
 0x1dc   :  { %2168 = vmatmul.bf16.gmra.mxu2 %v4170_v53  ;;  %v2284_v25 = vrot.slane %v2283_v49, 2  ;;  %v2218_v53 = vadd.f32 %v4375_v17, %v1925_v16 }
 0x1de   :  { %v2285_v24 = vmax.f32 %v2283_v49, %v2284_v25 }
 0x1df   :  { %v1973_v14 = vpop.f32.mrf.mxu2  ;;  %v1877_v59 = vpop.f32.mrf.mxu0 }
 0x1e0   :  { %v2022_v33 = vpop.f32.mrf.mxu3  ;;  %v2286_v15 = vrot.slane %v2285_v24, 1  ;;  %v1878_v62 = vadd.f32 %v1877_v59, %v4295_v58  ;;  %v1926_v27 = vpop.f32.mrf.mxu1 }
 0x1e1   :  { %v4404_v23 = vadd.f32 %v2022_v33, %v1973_v14 }
 0x1e2   :  { %v2287_v20 = vmax.f32 %v2285_v24, %v2286_v15  ;;  %v1927_v5 = vadd.f32 %v1926_v27, %v1878_v62 }
 0x1e4   :  { %v2433_v22 = vadd.f32 %v4399_v1, %v2287_v20  ;;  %v2221_v41 = vadd.f32 %v4377_v7, %v1927_v5 }
 0x1e6   :  { %v2457_v32 = vmax.f32 %v2433_v22, 0.0  ;;  %v2302_v60 = vmax.f32 %v2218_v53, %v2221_v41 }
 0x1e7   :  { %v1975_v56 = vpop.f32.mrf.mxu2  ;;  %v1880_v38 = vpop.f32.mrf.mxu0 }
 0x1e8   :  { %v2024_v9 = vpop.f32.mrf.mxu3  ;;  %v2481_v50 = vpack.c.bf16 %v2457_v32, %v2457_v32  ;;  %v2303_v44 = vrot.slane %v2302_v60, 4  ;;  %v1881_v58 = vadd.f32 %v1880_v38, %v4302_v0  ;;  %v1929_v43 = vpop.f32.mrf.mxu1 }
 0x1e9   :  { %v4410_v40 = vadd.f32 %v2024_v9, %v1975_v56  ;;  %v4609_v9 = vld [vmem:[#allocation27_spill] sm:$0xff] }
 0x1ea   :  { %v2581_v52 = vunpack.c.l.b16 %v2481_v50  ;;  %v2304_v45 = vmax.f32 %v2302_v60, %v2303_v44  ;;  %v1930_v34 = vadd.f32 %v1929_v43, %v1881_v58  ;;  %2075 = vmatmul.bf16.gmra.mxu0 %v4024_v2  ;;  %v1839_v58 = vadd.f32 %v4322_v19, %v4320_v10 }
 0x1eb   :  { %2124 = vmatmul.bf16.gmra.mxu1 %v4604_v61 }
 0x1ec   :  { %2173 = vmatmul.bf16.gmra.mxu2 %v4184_v29  ;;  %v2622_v46 = vrot.slane %v2581_v52, 7  ;;  %v2305_v49 = vrot.slane %v2304_v45, 2  ;;  %v2224_v29 = vadd.f32 %v4375_v17, %v1930_v34 }
 0x1ee   :  { %v2623_v16 = vsel %vm2602_vm4, %v2622_v46, %v2578_v47  ;;  %v2306_v4 = vmax.f32 %v2304_v45, %v2305_v49 }
 0x1ef   :  { %v1978_v25 = vpop.f32.mrf.mxu2  ;;  %v1882_v14 = vpop.f32.mrf.mxu0 }
 0x1f0   :  { %v2027_v24 = vpop.f32.mrf.mxu3  ;;  %v2307_v0 = vrot.slane %v2306_v4, 1  ;;  %v1883_v33 = vadd.f32 %v1882_v14, %v4307_v21  ;;  %v1931_v59 = vpop.f32.mrf.mxu1 }
 0x1f1   :  { %v4417_v18 = vadd.f32 %v2027_v24, %v1978_v25 }
 0x1f2   :  { %v2308_v2 = vmax.f32 %v2306_v4, %v2307_v0  ;;  %v1932_v15 = vadd.f32 %v1931_v59, %v1883_v33 }
 0x1f4   :  { %v2436_v61 = vadd.f32 %v4399_v1, %v2308_v2  ;;  %v2227_v62 = vadd.f32 %v4377_v7, %v1932_v15 }
 0x1f6   :  { %v2460_v27 = vmax.f32 %v2436_v61, 0.0  ;;  %v2323_v20 = vmax.f32 %v2224_v29, %v2227_v62 }
 0x1f7   :  { %v1980_v5 = vpop.f32.mrf.mxu2  ;;  %v1885_v22 = vpop.f32.mrf.mxu0 }
 0x1f8   :  { %v2029_v28 = vpop.f32.mrf.mxu3  ;;  %v2484_v53 = vpack.c.bf16 %v2460_v27, %v2460_v27  ;;  %v2324_v41 = vrot.slane %v2323_v20, 4  ;;  %v1934_v60 = vpop.f32.mrf.mxu1  ;;  %v1886_v44 = vadd.f32 %v1885_v22, %v4315_v37 }
 0x1f9   :  { %v4423_v32 = vadd.f32 %v2029_v28, %v1980_v5  ;;  %v4610_v5 = vld [vmem:[#allocation22_spill] sm:$0xff]  ;;  %v4611_v28 = vld [vmem:[#allocation28_spill] sm:$0xff] }
 0x1fa   :  { %v2584_v21 = vunpack.c.l.b16 %v2484_v53  ;;  %v2325_v56 = vmax.f32 %v2323_v20, %v2324_v41  ;;  %2080 = vmatmul.bf16.gmra.mxu0 %v4608_v48  ;;  %v1935_v49 = vadd.f32 %v1934_v60, %v1886_v44  ;;  %v1844_v60 = vadd.f32 %v4337_v51, %v4335_v31 }
 0x1fb   :  { %2129 = vmatmul.bf16.gmra.mxu1 %v4605_v26 }
 0x1fc   :  { %2178 = vmatmul.bf16.gmra.mxu2 %v4609_v9  ;;  %v2624_v38 = vrot.slane %v2584_v21, 6  ;;  %v2326_v50 = vrot.slane %v2325_v56, 2  ;;  %v2230_v37 = vadd.f32 %v4375_v17, %v1935_v49 }
 0x1fe   :  { %v2625_v43 = vsel %vm2605_vm5, %v2624_v38, %v2623_v16  ;;  %v2327_v52 = vmax.f32 %v2325_v56, %v2326_v50 }
 0x1ff   :  { %v1983_v45 = vpop.f32.mrf.mxu2  ;;  %v1887_v47 = vpop.f32.mrf.mxu0 }
 0x200   :  { %v2032_v34 = vpop.f32.mrf.mxu3  ;;  %v2328_v46 = vrot.slane %v2327_v52, 1  ;;  %v1888_v26 = vadd.f32 %v1887_v47, %v1839_v58  ;;  %v1936_v25 = vpop.f32.mrf.mxu1  ;;  %v3610_v47 = vld [vmem:[#allocation10 + $0x78] sm:$0xff] }
 0x201   :  { %v4432_v4 = vadd.f32 %v2032_v34, %v1983_v45  ;;  %2813 = vmatpush.bf16.msra.mxu3 %v3610_v47 }
 0x202   :  { %v2329_v24 = vmax.f32 %v2327_v52, %v2328_v46  ;;  %v1937_v14 = vadd.f32 %v1936_v25, %v1888_v26  ;;  %v3609_v26 = vld [vmem:[#allocation10 + $0x70] sm:$0xff] }
 0x204   :  { %v2439_v0 = vadd.f32 %v4399_v1, %v2329_v24  ;;  %v2233_v10 = vadd.f32 %v4377_v7, %v1937_v14 }
 0x205   :  { %2814 = vmatpush.bf16.msra.mxu3 %v3609_v26 }
 0x206   :  { %v2463_v19 = vmax.f32 %v2439_v0, 0.0  ;;  %v2344_v16 = vmax.f32 %v2230_v37, %v2233_v10 }
 0x207   :  { %v1985_v33 = vpop.f32.mrf.mxu2  ;;  %v1890_v2 = vpop.f32.mrf.mxu0 }
 0x208   :  { %v2034_v59 = vpop.f32.mrf.mxu3  ;;  %v2487_v15 = vpack.c.bf16 %v2463_v19, %v2463_v19  ;;  %v2345_v61 = vrot.slane %v2344_v16, 4  ;;  %v1939_v62 = vpop.f32.mrf.mxu1  ;;  %v1891_v41 = vadd.f32 %v1890_v2, %v4330_v13 }
 0x209   :  { %v4437_v29 = vadd.f32 %v2034_v59, %v1985_v33  ;;  %v4612_v33 = vld [vmem:[#allocation24_spill] sm:$0xff] }
 0x20a   :  { %v2587_v27 = vunpack.c.l.b16 %v2487_v15  ;;  %v2346_v20 = vmax.f32 %v2344_v16, %v2345_v61  ;;  %2085 = vmatmul.bf16.gmra.mxu0 %v4610_v5  ;;  %v1940_v44 = vadd.f32 %v1939_v62, %v1891_v41  ;;  %v3608_v59 = vld [vmem:[#allocation10 + $0x68] sm:$0xff]  ;;  %v1849_v62 = vadd.f32 %v4352_v30, %v4350_v35  ;;  %v3607_v5 = vld [vmem:[#allocation10 + $0x60] sm:$0xff] }
 0x20b   :  { %2134 = vmatmul.bf16.gmra.mxu1 %v4606_v6  ;;  %2815 = vmatpush.bf16.msra.mxu3 %v3608_v59 }
 0x20c   :  { %2183 = vmatmul.bf16.gmra.mxu2 %v4611_v28  ;;  %v2626_v22 = vrot.slane %v2587_v27, 5  ;;  %v2347_v53 = vrot.slane %v2346_v20, 2  ;;  %v2236_v46 = vadd.f32 %v4375_v17, %v1940_v44 }
 0x20e   :  { %v2627_v21 = vsel %vm2608_vm6, %v2626_v22, %v2625_v43  ;;  %v2348_v56 = vmax.f32 %v2346_v20, %v2347_v53 }
 0x20f   :  { %v1988_v48 = vpop.f32.mrf.mxu2  ;;  %v1892_v38 = vpop.f32.mrf.mxu0  ;;  %2816 = vmatpush.bf16.msra.mxu3 %v3607_v5 }
 0x210   :  { %v2037_v9 = vpop.f32.mrf.mxu3  ;;  %v2349_v50 = vrot.slane %v2348_v56, 1  ;;  %v1893_v6 = vadd.f32 %v1892_v38, %v1844_v60  ;;  %v1941_v52 = vpop.f32.mrf.mxu1 }
 0x211   :  { %v4446_v58 = vadd.f32 %v2037_v9, %v1988_v48  ;;  %v3606_v9 = vld [vmem:[#allocation10 + $0x58] sm:$0xff] }
 0x212   :  { %v2350_v45 = vmax.f32 %v2348_v56, %v2349_v50  ;;  %v1942_v34 = vadd.f32 %v1941_v52, %v1893_v6  ;;  %v3605_v6 = vld [vmem:[#allocation10 + $0x50] sm:$0xff] }
 0x213   :  { %2817 = vmatpush.bf16.msra.mxu3 %v3606_v9 }
 0x214   :  { %v2442_v13 = vadd.f32 %v4399_v1, %v2350_v45  ;;  %v2239_v31 = vadd.f32 %v4377_v7, %v1942_v34 }
 0x216   :  { %v2466_v51 = vmax.f32 %v2442_v13, 0.0  ;;  %v2365_v43 = vmax.f32 %v2236_v46, %v2239_v31 }
 0x217   :  { %v1990_v49 = vpop.f32.mrf.mxu2  ;;  %v1895_v24 = vpop.f32.mrf.mxu0  ;;  %2818 = vmatpush.bf16.msra.mxu3 %v3605_v6 }
 0x218   :  { %v2039_v25 = vpop.f32.mrf.mxu3  ;;  %v2490_v14 = vpack.c.bf16 %v2466_v51, %v2466_v51  ;;  %v2366_v0 = vrot.slane %v2365_v43, 4  ;;  %v1944_v10 = vpop.f32.mrf.mxu1  ;;  %v1896_v61 = vadd.f32 %v1895_v24, %v4345_v3 }
 0x219   :  { %v4451_v37 = vadd.f32 %v2039_v25, %v1990_v49  ;;  %v3604_v49 = vld [vmem:[#allocation10 + $0x48] sm:$0xff] }
 0x21a   :  { %v2590_v19 = vunpack.c.l.b16 %v2490_v14  ;;  %v2367_v16 = vmax.f32 %v2365_v43, %v2366_v0  ;;  %2090 = vmatmul.bf16.gmra.mxu0 %v4612_v33  ;;  %v1945_v60 = vadd.f32 %v1944_v10, %v1896_v61  ;;  %v4613_v43 = vld [vmem:[#allocation26_spill] sm:$0xff]  ;;  %v3603_v10 = vld [vmem:[#allocation10 + $0x40] sm:$0xff] }
 0x21b   :  { %2139 = vmatmul.bf16.gmra.mxu1 %v4607_v57  ;;  %2819 = vmatpush.bf16.msra.mxu3 %v3604_v49 }
 0x21c   :  { %2188 = vmatmul.bf16.gmra.mxu2 %v4226_v39  ;;  %v2628_v2 = vrot.slane %v2590_v19, 4  ;;  %v2368_v15 = vrot.slane %v2367_v16, 2  ;;  %v2242_v35 = vadd.f32 %v4375_v17, %v1945_v60 }
 0x21e   :  { %v2369_v27 = vmax.f32 %v2367_v16, %v2368_v15  ;;  %v2629_v28 = vsel %vm2611_vm7, %v2628_v2, %v2627_v21 }
 0x21f   :  { %v1993_v20 = vpop.f32.mrf.mxu2  ;;  %v1897_v53 = vpop.f32.mrf.mxu0  ;;  %2820 = vmatpush.bf16.msra.mxu3 %v3603_v10 }
 0x220   :  { %v2042_v22 = vpop.f32.mrf.mxu3  ;;  %v2370_v41 = vrot.slane %v2369_v27, 1  ;;  %v1898_v39 = vadd.f32 %v1897_v53, %v1849_v62  ;;  %v1946_v56 = vpop.f32.mrf.mxu1 }
 0x221   :  { %v4460_v57 = vadd.f32 %v2042_v22, %v1993_v20 }
 0x222   :  { %v2371_v48 = vmax.f32 %v2369_v27, %v2370_v41  ;;  %v1947_v3 = vadd.f32 %v1946_v56, %v1898_v39 }
 0x224   :  { %v2445_v38 = vadd.f32 %v4399_v1, %v2371_v48  ;;  %v2245_v30 = vadd.f32 %v4377_v7, %v1947_v3 }
 0x226   :  { %v2469_v21 = vmax.f32 %v2445_v38, 0.0  ;;  %v2386_v50 = vmax.f32 %v2242_v35, %v2245_v30 }
 0x227   :  { %v1995_v44 = vpop.f32.mrf.mxu2  ;;  %v1900_v45 = vpop.f32.mrf.mxu0 }
 0x228   :  { %v2044_v52 = vpop.f32.mrf.mxu3  ;;  %v2493_v34 = vpack.c.bf16 %v2469_v21, %v2469_v21  ;;  %v2387_v47 = vrot.slane %v2386_v50, 4  ;;  %v1949_v46 = vpop.f32.mrf.mxu1  ;;  %v1901_v24 = vadd.f32 %v1900_v45, %v4360_v55 }
 0x229   :  { %v4465_v13 = vadd.f32 %v2044_v52, %v1995_v44 }
 0x22a   :  { %v2593_v31 = vunpack.c.l.b16 %v2493_v34  ;;  %v2388_v51 = vmax.f32 %v2386_v50, %v2387_v47  ;;  %2095 = vmatmul.bf16.gmra.mxu0 %v4613_v43  ;;  %v1950_v2 = vadd.f32 %v1949_v46, %v1901_v24  ;;  %v4486_v43 = vld [vmem:[#allocation8 + $0x28] sm:$0xff] }
 0x22b   :  { %2144 = vmatmul.bf16.gmra.mxu1 %v4134_v12 }
 0x22c   :  { %2193 = vmatmul.bf16.gmra.mxu2 %v4240_v36  ;;  %v2630_v26 = vrot.slane %v2593_v31, 3  ;;  %v2389_v25 = vrot.slane %v2388_v51, 2  ;;  %v2248_v27 = vadd.f32 %v4375_v17, %v1950_v2  ;;  %v4484_v31 = vld [vmem:[#allocation8 + $0x10] sm:$0xff] }
 0x22e   :  { %v2390_v14 = vmax.f32 %v2388_v51, %v2389_v25  ;;  %v2631_v19 = vsel %vm2614_vm8, %v2630_v26, %v2629_v28 }
 0x22f   :  { %v1998_v0 = vpop.f32.mrf.mxu2  ;;  %v1902_v33 = vpop.f32.mrf.mxu0 }
 0x230   :  { %v2047_v16 = vpop.f32.mrf.mxu3  ;;  %v2391_v59 = vrot.slane %v2390_v14, 1  ;;  %v1903_v12 = vadd.f32 %v1902_v33, %v4366_v11  ;;  %v1951_v61 = vpop.f32.mrf.mxu1 }
 0x231   :  { %v4472_v15 = vadd.f32 %v2047_v16, %v1998_v0 }
 0x232   :  { %v2392_v36 = vmax.f32 %v2390_v14, %v2391_v59  ;;  %v1952_v62 = vadd.f32 %v1951_v61, %v1903_v12 }
 0x234   :  { %v2448_v55 = vadd.f32 %v4399_v1, %v2392_v36  ;;  %v2251_v20 = vadd.f32 %v4377_v7, %v1952_v62 }
 0x236   :  { %v2472_v5 = vmax.f32 %v2448_v55, 0.0  ;;  %v2407_v28 = vmax.f32 %v2248_v27, %v2251_v20 }
 0x237   :  { %v2000_v22 = vpop.f32.mrf.mxu2  ;;  %v2061_v41 = vpop.f32.mrf.mxu0 }
 0x238   :  { %v2049_v53 = vpop.f32.mrf.mxu3  ;;  %v2496_v60 = vpack.c.bf16 %v2472_v5, %v2472_v5  ;;  %v2408_v39 = vrot.slane %v2407_v28, 4  ;;  %v2062_v11 = vadd.f32 %v2061_v41, %v4372_v63  ;;  %v2110_v48 = vpop.f32.mrf.mxu1 }
 0x239   :  { %v4478_v56 = vadd.f32 %v2049_v53, %v2000_v22 }
 0x23a   :  { %v2596_v3 = vunpack.c.l.b16 %v2496_v60  ;;  %v2409_v9 = vmax.f32 %v2407_v28, %v2408_v39  ;;  %v2111_v38 = vadd.f32 %v2110_v48, %v2062_v11 }
 0x23c   :  { %v2632_v35 = vrot.slane %v2596_v3, 2  ;;  %v2410_v30 = vrot.slane %v2409_v9, 2 }
 0x23e   :  { %v2411_v17 = vmax.f32 %v2409_v9, %v2410_v30  ;;  %v2633_v7 = vsel %vm2617_vm9, %v2632_v35, %v2631_v19 }
 0x23f   :  { %v2159_v21 = vpop.f32.mrf.mxu2  ;;  %v2063_v44 = vpop.f32.mrf.mxu0 }
 0x240   :  { %v2160_v50 = vadd.f32 %v2159_v21, %v2111_v38  ;;  %v2412_v6 = vrot.slane %v2411_v17, 1  ;;  %v2064_v52 = vadd.f32 %v2063_v44, %v4382_v54  ;;  %v2112_v45 = vpop.f32.mrf.mxu1 }
 0x242   :  { %v2413_v34 = vmax.f32 %v2411_v17, %v2412_v6  ;;  %v2113_v47 = vadd.f32 %v2112_v45, %v2064_v52  ;;  %v2207_v0 = vadd.f32 %v4484_v31, %v2160_v50 }
 0x244   :  { %v2451_v63 = vadd.f32 %v4399_v1, %v2413_v34 }
 0x246   :  { %v2475_v46 = vmax.f32 %v2451_v63, 0.0 }
 0x247   :  { %v2161_v51 = vpop.f32.mrf.mxu2  ;;  %v2066_v26 = vpop.f32.mrf.mxu0 }
 0x248   :  { %v2162_v49 = vadd.f32 %v2161_v51, %v2113_v47  ;;  %v2499_v25 = vpack.c.bf16 %v2475_v46, %v2475_v46  ;;  %v2067_v24 = vadd.f32 %v2066_v26, %v4389_v8  ;;  %v2115_v14 = vpop.f32.mrf.mxu1 }
 0x24a   :  { %v2210_v54 = vadd.f32 %v4486_v43, %v2162_v49  ;;  %v2599_v10 = vunpack.c.l.b16 %v2499_v25  ;;  %v2116_v19 = vadd.f32 %v2115_v14, %v2067_v24 }
 0x24c   :  { %v2267_v16 = vmax.f32 %v2207_v0, %v2210_v54  ;;  %v2634_v1 = vrot.slane %v2599_v10, 1 }
 0x24e   :  { %v2268_v33 = vrot.slane %v2267_v16, 4  ;;  %v2635_v2 = vsel %vm2620_vm10, %v2634_v1, %v2633_v7 }
 0x24f   :  { %v2164_v59 = vpop.f32.mrf.mxu2  ;;  %v2068_v61 = vpop.f32.mrf.mxu0  ;;  %v2651_v36 = vpack.c.b16 %v2635_v2, %v2635_v2 }
 0x250   :  { %v2165_v12 = vadd.f32 %v2164_v59, %v2116_v19  ;;  %v2069_v62 = vadd.f32 %v2068_v61, %v4394_v42  ;;  %v2117_v55 = vpop.f32.mrf.mxu1  ;;  %v2269_v8 = vmax.f32 %v2267_v16, %v2268_v33 }
 0x251   :  { %2821 = vmatmul.bf16.vlgmr.msra.gmra.mxu3 %v2651_v36 }
 0x252   :  { %v2118_v27 = vadd.f32 %v2117_v55, %v2069_v62  ;;  %v4493_v20 = vpop.f32.mrf.mxu3  ;;  %v2270_v5 = vrot.slane %v2269_v8, 2  ;;  %v2213_v11 = vadd.f32 %v4484_v31, %v2165_v12 }
 0x254   :  { %v2271_v39 = vmax.f32 %v2269_v8, %v2270_v5 }
 0x256   :  { %v2272_v38 = vrot.slane %v2271_v39, 1 }
 0x257   :  { %v2166_v28 = vpop.f32.mrf.mxu2  ;;  %v2071_v53 = vpop.f32.mrf.mxu0 }
 0x258   :  { %v2167_v22 = vadd.f32 %v2166_v28, %v2118_v27  ;;  %v2072_v41 = vadd.f32 %v2071_v53, %v4404_v23  ;;  %v2120_v60 = vpop.f32.mrf.mxu1  ;;  %v2273_v6 = vmax.f32 %v2271_v39, %v2272_v38  ;;  %v3659_v23 = vld [vmem:[#allocation7] sm:$0x7] }
 0x259   :  { %v4499_v52 = vperm.slane %v3659_v23, 2 }
 0x25a   :  { %v2216_v48 = vadd.f32 %v4486_v43, %v2167_v22  ;;  %v2121_v3 = vadd.f32 %v2120_v60, %v2072_v41  ;;  %v2811_v42 = vpop.f32.mrf.mxu3 }
 0x25b   :  { %v2431_v63 = vadd.f32 %v4499_v52, %v2273_v6 }
 0x25c   :  { %v2288_v9 = vmax.f32 %v2213_v11, %v2216_v48 }
 0x25d   :  { %v2455_v0 = vmax.f32 %v2431_v63, 0.0 }
 0x25e   :  { %v2289_v35 = vrot.slane %v2288_v9, 4 }
 0x25f   :  { %v2169_v30 = vpop.f32.mrf.mxu2  ;;  %v2073_v7 = vpop.f32.mrf.mxu0  ;;  %v2479_v33 = vpack.c.bf16 %v2455_v0, %v2455_v0 }
 0x260   :  { %v2290_v17 = vmax.f32 %v2288_v9, %v2289_v35  ;;  %v2170_v21 = vadd.f32 %v2169_v30, %v2121_v3  ;;  %v2074_v50 = vadd.f32 %v2073_v7, %v4410_v40  ;;  %v2122_v44 = vpop.f32.mrf.mxu1 }
 0x261   :  { %v2579_v8 = vunpack.c.l.b16 %v2479_v33 }
 0x262   :  { %v2291_v45 = vrot.slane %v2290_v17, 2  ;;  %v2123_v34 = vadd.f32 %v2122_v44, %v2074_v50  ;;  %v2219_v54 = vadd.f32 %v4484_v31, %v2170_v21 }
 0x264   :  { %v2292_v47 = vmax.f32 %v2290_v17, %v2291_v45 }
 0x266   :  { %v2293_v46 = vrot.slane %v2292_v47, 1 }
 0x267   :  { %v2171_v51 = vpop.f32.mrf.mxu2  ;;  %v2076_v25 = vpop.f32.mrf.mxu0 }
 0x268   :  { %v2294_v49 = vmax.f32 %v2292_v47, %v2293_v46  ;;  %v2172_v26 = vadd.f32 %v2171_v51, %v2123_v34  ;;  %v2077_v24 = vadd.f32 %v2076_v25, %v4417_v18  ;;  %v2125_v14 = vpop.f32.mrf.mxu1 }
 0x26a   :  { %v2434_v40 = vadd.f32 %v4499_v52, %v2294_v49  ;;  %v2222_v10 = vadd.f32 %v4486_v43, %v2172_v26  ;;  %v2126_v19 = vadd.f32 %v2125_v14, %v2077_v24 }
 0x26c   :  { %v2458_v16 = vmax.f32 %v2434_v40, 0.0  ;;  %v2309_v1 = vmax.f32 %v2219_v54, %v2222_v10 }
 0x26e   :  { %v2482_v59 = vpack.c.bf16 %v2458_v16, %v2458_v16  ;;  %v2310_v2 = vrot.slane %v2309_v1, 4 }
 0x26f   :  { %v2174_v12 = vpop.f32.mrf.mxu2  ;;  %v2078_v55 = vpop.f32.mrf.mxu0 }
 0x270   :  { %v2582_v61 = vunpack.c.l.b16 %v2482_v59  ;;  %v2311_v36 = vmax.f32 %v2309_v1, %v2310_v2  ;;  %v2175_v62 = vadd.f32 %v2174_v12, %v2126_v19  ;;  %v2127_v18 = vpop.f32.mrf.mxu1  ;;  %v2079_v28 = vadd.f32 %v2078_v55, %v4423_v32 }
 0x272   :  { %v2636_v27 = vrot.slane %v2582_v61, 7  ;;  %v2312_v5 = vrot.slane %v2311_v36, 2  ;;  %v2128_v60 = vadd.f32 %v2127_v18, %v2079_v28  ;;  %v2225_v38 = vadd.f32 %v4484_v31, %v2175_v62 }
 0x274   :  { %v2637_v22 = vsel %vm2602_vm4, %v2636_v27, %v2579_v8  ;;  %v2313_v53 = vmax.f32 %v2311_v36, %v2312_v5 }
 0x276   :  { %v2314_v41 = vrot.slane %v2313_v53, 1 }
 0x277   :  { %v2176_v39 = vpop.f32.mrf.mxu2  ;;  %v2081_v3 = vpop.f32.mrf.mxu0 }
 0x278   :  { %v2315_v11 = vmax.f32 %v2313_v53, %v2314_v41  ;;  %v2177_v48 = vadd.f32 %v2176_v39, %v2128_v60  ;;  %v2130_v42 = vpop.f32.mrf.mxu1  ;;  %v2082_v6 = vadd.f32 %v2081_v3, %v4432_v4 }
 0x27a   :  { %v2437_v9 = vadd.f32 %v4499_v52, %v2315_v11  ;;  %v2228_v35 = vadd.f32 %v4486_v43, %v2177_v48  ;;  %v2131_v49 = vadd.f32 %v2130_v42, %v2082_v6  ;;  %v3618_v11 = vld [vmem:[#allocation10 + $0xb8] sm:$0xff] }
 0x27b   :  { %2826 = vmatpush.bf16.msrb.mxu3 %v3618_v11 }
 0x27c   :  { %v2461_v30 = vmax.f32 %v2437_v9, 0.0  ;;  %v2330_v17 = vmax.f32 %v2225_v38, %v2228_v35  ;;  %v3617_v35 = vld [vmem:[#allocation10 + $0xb0] sm:$0xff] }
 0x27e   :  { %v2485_v21 = vpack.c.bf16 %v2461_v30, %v2461_v30  ;;  %v2331_v32 = vrot.slane %v2330_v17, 4 }
 0x27f   :  { %v2179_v7 = vpop.f32.mrf.mxu2  ;;  %v2083_v23 = vpop.f32.mrf.mxu0  ;;  %2827 = vmatpush.bf16.msrb.mxu3 %v3617_v35 }
 0x280   :  { %v2585_v50 = vunpack.c.l.b16 %v2485_v21  ;;  %v2332_v44 = vmax.f32 %v2330_v17, %v2331_v32  ;;  %v2132_v45 = vpop.f32.mrf.mxu1  ;;  %v2084_v63 = vadd.f32 %v2083_v23, %v4437_v29  ;;  %v2180_v25 = vadd.f32 %v2179_v7, %v2131_v49 }
 0x282   :  { %v2638_v34 = vrot.slane %v2585_v50, 6  ;;  %v2333_v47 = vrot.slane %v2332_v44, 2  ;;  %v2133_v24 = vadd.f32 %v2132_v45, %v2084_v63  ;;  %v2231_v19 = vadd.f32 %v4484_v31, %v2180_v25  ;;  %v3616_v50 = vld [vmem:[#allocation10 + $0xa8] sm:$0xff] }
 0x283   :  { %2828 = vmatpush.bf16.msrb.mxu3 %v3616_v50 }
 0x284   :  { %v2639_v46 = vsel %vm2605_vm5, %v2638_v34, %v2637_v22  ;;  %v2334_v51 = vmax.f32 %v2332_v44, %v2333_v47 }
 0x286   :  { %v2335_v26 = vrot.slane %v2334_v51, 1 }
 0x287   :  { %v2181_v14 = vpop.f32.mrf.mxu2  ;;  %v2086_v54 = vpop.f32.mrf.mxu0 }
 0x288   :  { %v2336_v0 = vmax.f32 %v2334_v51, %v2335_v26  ;;  %v2182_v40 = vadd.f32 %v2181_v14, %v2133_v24  ;;  %v2135_v10 = vpop.f32.mrf.mxu1  ;;  %v2087_v36 = vadd.f32 %v2086_v54, %v4446_v58  ;;  %v3615_v51 = vld [vmem:[#allocation10 + $0xa0] sm:$0xff]  ;;  %v3614_v54 = vld [vmem:[#allocation10 + $0x98] sm:$0xff] }
 0x289   :  { %2829 = vmatpush.bf16.msrb.mxu3 %v3615_v51 }
 0x28a   :  { %v2440_v4 = vadd.f32 %v4499_v52, %v2336_v0  ;;  %v2234_v16 = vadd.f32 %v4486_v43, %v2182_v40  ;;  %v2136_v22 = vadd.f32 %v2135_v10, %v2087_v36  ;;  %v3612_v36 = vld [vmem:[#allocation10 + $0x88] sm:$0xff] }
 0x28c   :  { %v2464_v1 = vmax.f32 %v2440_v4, 0.0  ;;  %v2351_v29 = vmax.f32 %v2231_v19, %v2234_v16 }
 0x28d   :  { %2830 = vmatpush.bf16.msrb.mxu3 %v3614_v54 }
 0x28e   :  { %v2488_v33 = vpack.c.bf16 %v2464_v1, %v2464_v1  ;;  %v2352_v59 = vrot.slane %v2351_v29, 4 }
 0x28f   :  { %v2184_v2 = vpop.f32.mrf.mxu2  ;;  %v2088_v62 = vpop.f32.mrf.mxu0 }
 0x290   :  { %v2588_v12 = vunpack.c.l.b16 %v2488_v33  ;;  %v2353_v61 = vmax.f32 %v2351_v29, %v2352_v59  ;;  %v2137_v55 = vpop.f32.mrf.mxu1  ;;  %v2089_v27 = vadd.f32 %v2088_v62, %v4451_v37  ;;  %v2185_v41 = vadd.f32 %v2184_v2, %v2136_v22  ;;  %v3613_v29 = vld [vmem:[#allocation10 + $0x90] sm:$0xff]  ;;  %v3611_v22 = vld [vmem:[#allocation10 + $0x80] sm:$0xff] }
 0x291   :  { %2831 = vmatpush.bf16.msrb.mxu3 %v3613_v29 }
 0x292   :  { %v2640_v18 = vrot.slane %v2588_v12, 5  ;;  %v2354_v8 = vrot.slane %v2353_v61, 2  ;;  %v2138_v60 = vadd.f32 %v2137_v55, %v2089_v27  ;;  %v2237_v38 = vadd.f32 %v4484_v31, %v2185_v41 }
 0x294   :  { %v2641_v5 = vsel %vm2608_vm6, %v2640_v18, %v2639_v46  ;;  %v2355_v28 = vmax.f32 %v2353_v61, %v2354_v8 }
 0x295   :  { %2832 = vmatpush.bf16.msrb.mxu3 %v3612_v36 }
 0x296   :  { %v2356_v53 = vrot.slane %v2355_v28, 1 }
 0x297   :  { %v2186_v39 = vpop.f32.mrf.mxu2  ;;  %v2091_v42 = vpop.f32.mrf.mxu0 }
 0x298   :  { %v2357_v48 = vmax.f32 %v2355_v28, %v2356_v53  ;;  %v2187_v3 = vadd.f32 %v2186_v39, %v2138_v60  ;;  %v2140_v9 = vpop.f32.mrf.mxu1  ;;  %v2092_v23 = vadd.f32 %v2091_v42, %v4460_v57 }
 0x299   :  { %2833 = vmatpush.bf16.msrb.mxu3 %v3611_v22 }
 0x29a   :  { %v2443_v58 = vadd.f32 %v4499_v52, %v2357_v48  ;;  %v2240_v37 = vadd.f32 %v4486_v43, %v2187_v3  ;;  %v2141_v26 = vadd.f32 %v2140_v9, %v2092_v23 }
 0x29c   :  { %v2467_v30 = vmax.f32 %v2443_v58, 0.0  ;;  %v2372_v17 = vmax.f32 %v2237_v38, %v2240_v37 }
 0x29e   :  { %v2491_v21 = vpack.c.bf16 %v2467_v30, %v2467_v30  ;;  %v2373_v32 = vrot.slane %v2372_v17, 4 }
 0x29f   :  { %v2189_v7 = vpop.f32.mrf.mxu2  ;;  %v2093_v45 = vpop.f32.mrf.mxu0 }
 0x2a0   :  { %v2591_v44 = vunpack.c.l.b16 %v2491_v21  ;;  %v2374_v6 = vmax.f32 %v2372_v17, %v2373_v32  ;;  %v2142_v34 = vpop.f32.mrf.mxu1  ;;  %v2094_v46 = vadd.f32 %v2093_v45, %v4465_v13  ;;  %v2190_v14 = vadd.f32 %v2189_v7, %v2141_v26 }
 0x2a2   :  { %v2642_v47 = vrot.slane %v2591_v44, 4  ;;  %v2375_v63 = vrot.slane %v2374_v6, 2  ;;  %v2143_v0 = vadd.f32 %v2142_v34, %v2094_v46  ;;  %v2243_v16 = vadd.f32 %v4484_v31, %v2190_v14 }
 0x2a4   :  { %v2376_v49 = vmax.f32 %v2374_v6, %v2375_v63  ;;  %v2643_v25 = vsel %vm2611_vm7, %v2642_v47, %v2641_v5 }
 0x2a6   :  { %v2377_v24 = vrot.slane %v2376_v49, 1 }
 0x2a7   :  { %v2191_v40 = vpop.f32.mrf.mxu2  ;;  %v2096_v4 = vpop.f32.mrf.mxu0 }
 0x2a8   :  { %v2378_v10 = vmax.f32 %v2376_v49, %v2377_v24  ;;  %v2192_v57 = vadd.f32 %v2191_v40, %v2143_v0  ;;  %v2145_v1 = vpop.f32.mrf.mxu1  ;;  %v2097_v18 = vadd.f32 %v2096_v4, %v4472_v15 }
 0x2aa   :  { %v2446_v19 = vadd.f32 %v4499_v52, %v2378_v10  ;;  %v2246_v13 = vadd.f32 %v4486_v43, %v2192_v57  ;;  %v2146_v41 = vadd.f32 %v2145_v1, %v2097_v18 }
 0x2ac   :  { %v2470_v33 = vmax.f32 %v2446_v19, 0.0  ;;  %v2393_v59 = vmax.f32 %v2243_v16, %v2246_v13 }
 0x2ae   :  { %v2494_v2 = vpack.c.bf16 %v2470_v33, %v2470_v33  ;;  %v2394_v12 = vrot.slane %v2393_v59, 4 }
 0x2af   :  { %v2194_v61 = vpop.f32.mrf.mxu2  ;;  %v2098_v8 = vpop.f32.mrf.mxu0 }
 0x2b0   :  { %v2594_v62 = vunpack.c.l.b16 %v2494_v2  ;;  %v2395_v55 = vmax.f32 %v2393_v59, %v2394_v12  ;;  %v2099_v28 = vadd.f32 %v2098_v8, %v4478_v56  ;;  %v2147_v39 = vpop.f32.mrf.mxu1  ;;  %v2195_v48 = vadd.f32 %v2194_v61, %v2146_v41 }
 0x2b2   :  { %v2644_v27 = vrot.slane %v2594_v62, 3  ;;  %v2396_v5 = vrot.slane %v2395_v55, 2  ;;  %v2148_v3 = vadd.f32 %v2147_v39, %v2099_v28  ;;  %v2249_v38 = vadd.f32 %v4484_v31, %v2195_v48  ;;  %v3650_v31 = vld [vmem:[%s4550_s5] ss:$0 sm:$0xff] }
 0x2b3   :  { %v2810_v51 = vadd.f32 %v3650_v31, %v4493_v20 }
 0x2b4   :  { %v2397_v53 = vmax.f32 %v2395_v55, %v2396_v5  ;;  %v2645_v60 = vsel %vm2614_vm8, %v2644_v27, %v2643_v25 }
 0x2b6   :  { %v2398_v11 = vrot.slane %v2397_v53, 1 }
 0x2b7   :  { %v2196_v42 = vpop.f32.mrf.mxu2 }
 0x2b8   :  { %v2399_v9 = vmax.f32 %v2397_v53, %v2398_v11  ;;  %v2197_v58 = vadd.f32 %v2196_v42, %v2148_v3 }
 0x2ba   :  { %v2449_v15 = vadd.f32 %v4499_v52, %v2399_v9  ;;  %v2252_v37 = vadd.f32 %v4486_v43, %v2197_v58 }
 0x2bc   :  { %v2473_v56 = vmax.f32 %v2449_v15, 0.0  ;;  %v2414_v35 = vmax.f32 %v2249_v38, %v2252_v37 }
 0x2be   :  { %v2497_v30 = vpack.c.bf16 %v2473_v56, %v2473_v56  ;;  %v2415_v17 = vrot.slane %v2414_v35, 4 }
 0x2c0   :  { %v2597_v21 = vunpack.c.l.b16 %v2497_v30  ;;  %v2416_v32 = vmax.f32 %v2414_v35, %v2415_v17 }
 0x2c2   :  { %v2646_v7 = vrot.slane %v2597_v21, 2  ;;  %v2417_v50 = vrot.slane %v2416_v32, 2 }
 0x2c4   :  { %v2418_v44 = vmax.f32 %v2416_v32, %v2417_v50  ;;  %v2647_v6 = vsel %vm2617_vm9, %v2646_v7, %v2645_v60 }
 0x2c6   :  { %v2419_v23 = vrot.slane %v2418_v44, 1 }
 0x2c8   :  { %v2420_v45 = vmax.f32 %v2418_v44, %v2419_v23 }
 0x2ca   :  { %v2452_v34 = vadd.f32 %v4499_v52, %v2420_v45 }
 0x2cc   :  { %v2476_v47 = vmax.f32 %v2452_v34, 0.0 }
 0x2ce   :  { %v2500_v63 = vpack.c.bf16 %v2476_v47, %v2476_v47 }
 0x2d0   :  { %v2600_v43 = vunpack.c.l.b16 %v2500_v63 }
 0x2d2   :  { %v2648_v46 = vrot.slane %v2600_v43, 1 }
 0x2d4   :  { %v2649_v49 = vsel %vm2620_vm10, %v2648_v46, %v2647_v6  ;;  %v2822_v26 = vpop.f32.mrf.mxu3 }
 0x2d5   :  { %v2652_v25 = vpack.c.b16 %v2649_v49, %v2649_v49  ;;  %v2823_v24 = vadd.f32 %v2822_v26, %v2810_v51 }
 0x2d7   :  { %2834 = vmatmul.bf16.vlgmr.msrb.gmra.mxu3 %v2652_v25 }
 0x2dc   :  { %v2824_v14 = vpop.f32.mrf.mxu3 }
 0x35a   :  { %v2835_v52 = vpop.f32.mrf.mxu3 }
 0x35b   :  { %v2836_v0 = vadd.f32 %v2835_v52, %v2823_v24 }
 0x35d   :  { %2839 = vst [vmem:[#allocation11] sm:$0xff] %v2836_v0 }
 0x35e   :  { %2850 = dma.vmem_to_hbm [thread:$0]  %s2846_s26, 128, %s2848_s29, [#allocation4]  }
 0x362   :  { %v2837_v20 = vpop.f32.mrf.mxu3 }
 0x363   :  { %3810 = dma.done.wait [#allocation4], 128  }
 0x364   :  { %3811 = vsyncadd [#allocation4], 4294967168 }
 0x365   :  { %2855 = vsyncpa [#allocation3], 1 }
 0x366   :  { %2856 = vsyncpa [#allocation6], 1 }
 0x367   :  { %2857 = vsyncpa [#allocation9], 1 }
 0x368   :  { %2858 = vsyncpa [#allocation4], 1 }

</bundles_post_ra>
